<compile_context>
chip_gen: v7x
topology: tpu7x:2x2x1
jax: 0.10.0
libtpu: 0.0.40
codegen_flags: <defaults>
</compile_context>

<pallas_src>
import functools
import math

import jax
import jax.numpy as jnp
from jax.experimental import pallas as pl
from jax.experimental.pallas import tpu as pltpu


def _align8(r):
    return ((r + 7) // 8) * 8


def _build_layout(rows_spec):
    """Row layout of a packed weight slab: every segment starts 8-sublane aligned."""
    lay, off = {}, 0
    for name, rows in rows_spec:
        lay[name] = (off, rows)
        off += _align8(rows)
    return lay, off


# ------------------------------ fused kernel ------------------------------- #

def _critic_fused_kernel(x_ref, adj_ref, act_ref, wa_ref, wb_ref, q_ref, *,
                         ks, lay_a, lay_b):
    """Full CriticNet forward for one graph (one grid step)."""
    f32 = jnp.float32

    def seg(ref, lay, name):
        off, rows = lay[name]
        return ref[off:off + rows, :]          # static slice of a VMEM-resident slab

    def sage_relu(x, adj, wl, wr, b):
        # SAGEConv(aggr='mean'):  relu( mean_agg(x) @ Wl + x @ Wr + bl )
        deg = jnp.sum(adj, axis=1, keepdims=True)                 # in-degree
        a_mean = adj / jnp.maximum(deg, 1.0)                      # zero rows if no nbrs
        agg = jnp.dot(a_mean, x, preferred_element_type=f32)
        out = (jnp.dot(agg, wl, preferred_element_type=f32)
               + jnp.dot(x, wr, preferred_element_type=f32) + b)
        return jnp.maximum(out, 0.0)

    def gcn_relu(x, adj, w, b):
        # GCNConv:  relu( D^{-1/2} (A + I) D^{-1/2} (x @ W) + b )
        n = adj.shape[0]
        ri = jax.lax.broadcasted_iota(jnp.int32, (n, n), 0)
        ci = jax.lax.broadcasted_iota(jnp.int32, (n, n), 1)
        a_sl = adj + (ri == ci).astype(f32)                       # add self loops
        dinv = jax.lax.rsqrt(jnp.sum(a_sl, axis=1, keepdims=True))
        xw = jnp.dot(x, w, preferred_element_type=f32)
        out = dinv * jnp.dot(a_sl, dinv * xw, preferred_element_type=f32)
        return jnp.maximum(out + b, 0.0)

    def topk_pool(x, adj, pw, k):
        # TopKPooling: score = tanh(x @ w / ||w||); keep top-k nodes; gate; gmp / gap.
        n, _ = x.shape
        w_norm = pw * jax.lax.rsqrt(jnp.sum(pw * pw, axis=1, keepdims=True))
        s_col = jnp.tanh(jnp.sum(x * w_norm, axis=1, keepdims=True))        # (n, 1)

        ri = jax.lax.broadcasted_iota(jnp.int32, (n, n), 0)
        ci = jax.lax.broadcasted_iota(jnp.int32, (n, n), 1)
        eye = (ri == ci).astype(f32)
        # Bit-exact sublane->lane copy of the score (diag mask + sublane reduce).
        s_row = jnp.sum(eye * s_col, axis=0, keepdims=True)                 # (1, n)

        # rank[j] = #{i : s[i] > s[j]  or  (s[i] == s[j] and i < j)}
        # -> descending score order with smallest-index tie-break (same selection
        #    ordering as the previous iterative argmax / torch.topk path).
        precede = (s_col > s_row) | ((s_col == s_row) & (ri < ci))          # (n, n)
        rank = jnp.sum(precede.astype(f32), axis=0,
                       keepdims=True).astype(jnp.int32)                     # (1, n)
        # One-hot selection matrix: P[r, j] = 1 iff rank[j] == r, for r < k.
        P = (jax.lax.broadcasted_iota(jnp.int32, (k, n), 0) == rank).astype(f32)

        # gate-then-gather == gather-then-gate (gating is per node).
        xg = jnp.dot(P, x * s_col, preferred_element_type=f32)              # (k, c)
        pa = jnp.dot(P, adj, preferred_element_type=f32)                    # (k, n)
        adj_sel = jax.lax.dot_general(                                      # (P A) P^T
            pa, P, (((1,), (1,)), ((), ())), preferred_element_type=f32)    # (k, k)

        gmp = jnp.max(xg, axis=0, keepdims=True)                            # (1, c)
        gap = jnp.sum(xg, axis=0, keepdims=True) * (1.0 / k)                # (1, c)
        return xg, adj_sel, gmp, gap

    x = x_ref[...]
    adj = adj_ref[...]

    x = sage_relu(x, adj, seg(wa_ref, lay_a, "w1l"), seg(wa_ref, lay_a, "w1r"),
                  seg(wa_ref, lay_a, "b1"))
    x, adj, gmp_sum, gap_sum = topk_pool(x, adj, seg(wa_ref, lay_a, "pw1"), ks[0])

    x = sage_relu(x, adj, seg(wa_ref, lay_a, "w2l"), seg(wa_ref, lay_a, "w2r"),
                  seg(wa_ref, lay_a, "b2"))
    x, adj, gmp, gap = topk_pool(x, adj, seg(wa_ref, lay_a, "pw2"), ks[1])
    gmp_sum += gmp
    gap_sum += gap

    x = gcn_relu(x, adj, seg(wa_ref, lay_a, "w3"), seg(wa_ref, lay_a, "b3"))
    x, adj, gmp, gap = topk_pool(x, adj, seg(wa_ref, lay_a, "pw3"), ks[2])
    gmp_sum += gmp
    gap_sum += gap

    x = gcn_relu(x, adj, seg(wa_ref, lay_a, "w4"), seg(wa_ref, lay_a, "b4"))
    x, adj, gmp, gap = topk_pool(x, adj, seg(wa_ref, lay_a, "pw4"), ks[3])
    gmp_sum += gmp
    gap_sum += gap

    # MLP head.  lin1 is split into gmp / gap / action row blocks so the
    # (1, 2*cw + out_dim) concat is never materialized; lin2/lin3 are lane-padded
    # with zeros (bit-identical).
    h = (jnp.dot(gmp_sum, seg(wb_ref, lay_b, "hw1_gmp"), preferred_element_type=f32)
         + jnp.dot(gap_sum, seg(wb_ref, lay_b, "hw1_gap"), preferred_element_type=f32)
         + jnp.dot(act_ref[...], seg(wb_ref, lay_b, "hw1_act"),
                   preferred_element_type=f32)
         + seg(wb_ref, lay_b, "hb1"))
    h = jnp.maximum(h, 0.0)
    h = jnp.maximum(jnp.dot(h, seg(wb_ref, lay_b, "hw2"), preferred_element_type=f32)
                    + seg(wb_ref, lay_b, "hb2"), 0.0)
    q = (jnp.dot(h, seg(wb_ref, lay_b, "hw3"), preferred_element_type=f32)
         + seg(wb_ref, lay_b, "hb3"))
    q_ref[...] = q[:, :1]


# ------------------------------- wrapper ----------------------------------- #

def critic_forward(slabs, x, adj, action_output, *, lay_a, lay_b, ratio=0.5):
    """Batched fused CriticNet forward.  x:(B,N,F)  adj:(B,N,N)  action:(B,1,out)."""
    b, n, feat = x.shape
    out_dim = action_output.shape[-1]
    slab_a, slab_b = slabs["slab_a"], slabs["slab_b"]

    ks, cur = [], n
    for _ in range(4):
        cur = int(math.ceil(ratio * cur))            # PyG: k = ceil(ratio * N)
        ks.append(cur)

    kernel = functools.partial(_critic_fused_kernel, ks=tuple(ks),
                               lay_a=lay_a, lay_b=lay_b)
    return pl.pallas_call(
        kernel,
        out_shape=jax.ShapeDtypeStruct((b, 1, 1), jnp.float32),
        grid=(b,),
        in_specs=[
            pl.BlockSpec((None, n, feat), lambda i: (i, 0, 0)),
            pl.BlockSpec((None, n, n), lambda i: (i, 0, 0)),
            pl.BlockSpec((None, 1, out_dim), lambda i: (i, 0, 0)),
            # weight slabs: constant block index -> DMA'd once, VMEM-resident
            pl.BlockSpec(slab_a.shape, lambda i: (0, 0)),
            pl.BlockSpec(slab_b.shape, lambda i: (0, 0)),
        ],
        out_specs=pl.BlockSpec((None, 1, 1), lambda i: (i, 0, 0)),
        compiler_params=pltpu.CompilerParams(
            dimension_semantics=("parallel",)),      # v7x: shard batch over both TCs
    )(x, adj, action_output, slab_a, slab_b)


# ----------------------------- parameter init ------------------------------ #

def init_params(key, output_dim=8, conv_width=64):
    def xav(k, fi, fo, gain=0.9):
        std = gain * math.sqrt(2.0 / (fi + fo))
        return std * jax.random.normal(k, (fi, fo), jnp.float32)   # stored [in, out]

    ks = jax.random.split(key, 18)
    return {
        "conv1": dict(wl=xav(ks[0], 2, conv_width),
                      bl=jax.random.normal(ks[1], (1, conv_width), jnp.float32),
                      wr=xav(ks[2], 2, conv_width)),
        "conv2": dict(wl=xav(ks[3], conv_width, conv_width),
                      bl=jax.random.normal(ks[4], (1, conv_width), jnp.float32),
                      wr=xav(ks[5], conv_width, conv_width)),
        # GCNConv bias defaults to zeros and is not touched by reset()
        "conv3": dict(w=xav(ks[6], conv_width, conv_width),
                      b=jnp.zeros((1, conv_width), jnp.float32)),
        "conv4": dict(w=xav(ks[7], conv_width, conv_width),
                      b=jnp.zeros((1, conv_width), jnp.float32)),
        "pool1": dict(w=jax.random.normal(ks[8], (conv_width,), jnp.float32)),
        "pool2": dict(w=jax.random.normal(ks[9], (conv_width,), jnp.float32)),
        "pool3": dict(w=jax.random.normal(ks[10], (conv_width,), jnp.float32)),
        "pool4": dict(w=jax.random.normal(ks[11], (conv_width,), jnp.float32)),
        "head": dict(
            w1=xav(ks[12], 2 * conv_width + output_dim, 128),
            b1=jax.random.normal(ks[13], (1, 128), jnp.float32),
            w2=xav(ks[14], 128, 100),
            b2=jax.random.normal(ks[15], (1, 100), jnp.float32),
            w3=xav(ks[16], 100, 1),
            b3=jax.random.normal(ks[17], (1, 1), jnp.float32),
        ),
    }


def prepare_kernel_params(p):
    """Pack all weights into two 8-sublane-aligned f32 slabs (numerically identical)."""
    f32 = jnp.float32
    c1, c2, c3, c4 = p["conv1"], p["conv2"], p["conv3"], p["conv4"]
    head = p["head"]
    in_feat = c1["wl"].shape[0]
    cw = c1["wl"].shape[1]
    hid1 = head["w1"].shape[1]                       # 128
    hid2 = head["w2"].shape[1]                       # 100
    out_dim = head["w1"].shape[0] - 2 * cw
    hid2_pad = ((hid2 + 127) // 128) * 128           # 100 -> 128 (zero padding)

    lay_a, rows_a = _build_layout([
        ("w1l", in_feat), ("w1r", in_feat), ("b1", 1),
        ("w2l", cw), ("w2r", cw), ("b2", 1),
        ("w3", cw), ("b3", 1),
        ("w4", cw), ("b4", 1),
        ("pw1", 1), ("pw2", 1), ("pw3", 1), ("pw4", 1),
    ])
    lay_b, rows_b = _build_layout([
        ("hw1_gmp", cw), ("hw1_gap", cw), ("hw1_act", out_dim), ("hb1", 1),
        ("hw2", hid1), ("hb2", 1),
        ("hw3", hid2_pad), ("hb3", 1),
    ])

    def put(slab, lay, name, arr):
        arr = jnp.asarray(arr, f32)
        off, _ = lay[name]
        return slab.at[off:off + arr.shape[0], :arr.shape[1]].set(arr)

    slab_a = jnp.zeros((rows_a, cw), f32)
    slab_a = put(slab_a, lay_a, "w1l", c1["wl"])
    slab_a = put(slab_a, lay_a, "w1r", c1["wr"])
    slab_a = put(slab_a, lay_a, "b1", c1["bl"])
    slab_a = put(slab_a, lay_a, "w2l", c2["wl"])
    slab_a = put(slab_a, lay_a, "w2r", c2["wr"])
    slab_a = put(slab_a, lay_a, "b2", c2["bl"])
    slab_a = put(slab_a, lay_a, "w3", c3["w"])
    slab_a = put(slab_a, lay_a, "b3", c3["b"])
    slab_a = put(slab_a, lay_a, "w4", c4["w"])
    slab_a = put(slab_a, lay_a, "b4", c4["b"])
    slab_a = put(slab_a, lay_a, "pw1", p["pool1"]["w"].reshape(1, cw))
    slab_a = put(slab_a, lay_a, "pw2", p["pool2"]["w"].reshape(1, cw))
    slab_a = put(slab_a, lay_a, "pw3", p["pool3"]["w"].reshape(1, cw))
    slab_a = put(slab_a, lay_a, "pw4", p["pool4"]["w"].reshape(1, cw))

    width_b = max(hid1, hid2_pad)
    slab_b = jnp.zeros((rows_b, width_b), f32)
    w1 = head["w1"]
    slab_b = put(slab_b, lay_b, "hw1_gmp", w1[:cw])
    slab_b = put(slab_b, lay_b, "hw1_gap", w1[cw:2 * cw])
    slab_b = put(slab_b, lay_b, "hw1_act", w1[2 * cw:])
    slab_b = put(slab_b, lay_b, "hb1", head["b1"])
    slab_b = put(slab_b, lay_b, "hw2", head["w2"])
    slab_b = put(slab_b, lay_b, "hb2", head["b2"])
    slab_b = put(slab_b, lay_b, "hw3", head["w3"])
    slab_b = put(slab_b, lay_b, "hb3", head["b3"])

    return {"slab_a": slab_a, "slab_b": slab_b}, lay_a, lay_b


# ---------------------------------- main ------------------------------------ #

if __name__ == "__main__":
    key = jax.random.PRNGKey(0)
    k_param, k_x, k_act = jax.random.split(key, 3)

    B = 2                # batch of graphs / states
    N = 16               # nodes per graph
    OUTPUT_DIM = 8       # actor output dim fed to the critic
    CONV_WIDTH = 64

    params = init_params(k_param, output_dim=OUTPUT_DIM, conv_width=CONV_WIDTH)
    slabs, lay_a, lay_b = prepare_kernel_params(params)

    # bidirectional ring graph -> dense Adj[i, j] = 1 iff edge j -> i (same topology
    # for every batch element; node features / actions differ per element)
    src = jnp.arange(N)
    dst = (src + 1) % N
    edge_index = jnp.concatenate(
        [jnp.stack([src, dst]), jnp.stack([dst, src])], axis=1)
    adj1 = jnp.zeros((N, N), jnp.float32).at[edge_index[1], edge_index[0]].set(1.0)
    adj = jnp.tile(adj1[None], (B, 1, 1))

    x = jax.random.normal(k_x, (B, N, 2), jnp.float32)
    action_output = jax.random.normal(k_act, (B, 1, OUTPUT_DIM), jnp.float32)

    fwd = jax.jit(functools.partial(critic_forward, lay_a=lay_a, lay_b=lay_b))
    q_values = fwd(slabs, x, adj, action_output)
    q_values = jax.block_until_ready(q_values)
    assert q_values.shape == (B, 1, 1) and q_values.dtype == jnp.float32

    print("KERNEL_OK")
</pallas_src>

<mosaic_0001>
module attributes {stable_mosaic.version = 11 : i64} {
  func.func @_critic_fused_kernel(%arg0: i32, %arg1: memref<1x16x2xf32, #tpu.memory_space<vmem>>, %arg2: memref<1x16x16xf32, #tpu.memory_space<vmem>>, %arg3: memref<1x1x8xf32, #tpu.memory_space<vmem>>, %arg4: memref<336x64xf32, #tpu.memory_space<vmem>>, %arg5: memref<416x128xf32, #tpu.memory_space<vmem>>, %arg6: memref<1x1x1xf32, #tpu.memory_space<vmem>>) attributes {dimension_semantics = [#tpu.dimension_semantics<parallel>], iteration_bounds = array<i64: 2>, scalar_prefetch = 0 : i64, scratch_operands = 0 : i64, tpu.core_type = #tpu.core_type<tc>, window_params = [{transform_indices = @transform_0, window_bounds = array<i64: 1, 16, 2>}, {transform_indices = @transform_1, window_bounds = array<i64: 1, 16, 16>}, {transform_indices = @transform_2, window_bounds = array<i64: 1, 1, 8>}, {pipeline_mode = #tpu.pipeline_mode<synchronous>, transform_indices = @transform_3, window_bounds = array<i64: 336, 64>}, {pipeline_mode = #tpu.pipeline_mode<synchronous>, transform_indices = @transform_4, window_bounds = array<i64: 416, 128>}, {transform_indices = @transform_5, window_bounds = array<i64: 1, 1, 1>}]} {
    %c0 = arith.constant 0 : index
    %c0_0 = arith.constant 0 : index
    %c0_1 = arith.constant 0 : index
    %0 = vector.load %arg1[%c0, %c0_0, %c0_1] : memref<1x16x2xf32, #tpu.memory_space<vmem>>, vector<1x16x2xf32>
    %1 = vector.shape_cast %0 : vector<1x16x2xf32> to vector<16x2xf32>
    %c0_2 = arith.constant 0 : index
    %c0_3 = arith.constant 0 : index
    %c0_4 = arith.constant 0 : index
    %2 = vector.load %arg2[%c0_2, %c0_3, %c0_4] : memref<1x16x16xf32, #tpu.memory_space<vmem>>, vector<1x16x16xf32>
    %3 = vector.shape_cast %2 : vector<1x16x16xf32> to vector<16x16xf32>
    %c0_5 = arith.constant 0 : index
    %c0_6 = arith.constant 0 : index
    %4 = vector.load %arg4[%c0_5, %c0_6] : memref<336x64xf32, #tpu.memory_space<vmem>>, vector<2x64xf32>
    %c8 = arith.constant 8 : index
    %c0_7 = arith.constant 0 : index
    %5 = vector.load %arg4[%c8, %c0_7] : memref<336x64xf32, #tpu.memory_space<vmem>>, vector<2x64xf32>
    %c16 = arith.constant 16 : index
    %c0_8 = arith.constant 0 : index
    %6 = vector.load %arg4[%c16, %c0_8] : memref<336x64xf32, #tpu.memory_space<vmem>>, vector<1x64xf32>
    %cst = arith.constant dense<0.000000e+00> : vector<16xf32>
    %7 = vector.multi_reduction <add>, %3, %cst [1] : vector<16x16xf32> to vector<16xf32>
    %8 = vector.shape_cast %7 : vector<16xf32> to vector<16x1xf32>
    %cst_9 = arith.constant 1.000000e+00 : f32
    %9 = vector.broadcast %cst_9 : f32 to vector<16x1xf32>
    %10 = arith.maximumf %8, %9 : vector<16x1xf32>
    %11 = vector.broadcast %10 : vector<16x1xf32> to vector<16x16xf32>
    %12 = arith.divf %3, %11 : vector<16x16xf32>
    %cst_10 = arith.constant dense<0.000000e+00> : vector<16x2xf32>
    %13 = tpu.matmul %12, %1, %cst_10 {dimension_numbers = #tpu.dot_dimension_numbers<[1], [0], [0], [1], [0, 0, 1, 1], [], []>} : vector<16x16xf32>, vector<16x2xf32>, vector<16x2xf32> -> vector<16x2xf32>
    %cst_11 = arith.constant dense<0.000000e+00> : vector<16x64xf32>
    %14 = tpu.matmul %13, %4, %cst_11 {dimension_numbers = #tpu.dot_dimension_numbers<[1], [0], [0], [1], [0, 0, 1, 1], [], []>} : vector<16x2xf32>, vector<2x64xf32>, vector<16x64xf32> -> vector<16x64xf32>
    %cst_12 = arith.constant dense<0.000000e+00> : vector<16x64xf32>
    %15 = tpu.matmul %1, %5, %cst_12 {dimension_numbers = #tpu.dot_dimension_numbers<[1], [0], [0], [1], [0, 0, 1, 1], [], []>} : vector<16x2xf32>, vector<2x64xf32>, vector<16x64xf32> -> vector<16x64xf32>
    %16 = arith.addf %14, %15 : vector<16x64xf32>
    %17 = vector.broadcast %6 : vector<1x64xf32> to vector<16x64xf32>
    %18 = arith.addf %16, %17 : vector<16x64xf32>
    %cst_13 = arith.constant 0.000000e+00 : f32
    %19 = vector.broadcast %cst_13 : f32 to vector<16x64xf32>
    %20 = arith.maximumf %18, %19 : vector<16x64xf32>
    %c304 = arith.constant 304 : index
    %c0_14 = arith.constant 0 : index
    %21 = vector.load %arg4[%c304, %c0_14] : memref<336x64xf32, #tpu.memory_space<vmem>>, vector<1x64xf32>
    %22 = arith.mulf %21, %21 : vector<1x64xf32>
    %cst_15 = arith.constant dense<0.000000e+00> : vector<1xf32>
    %23 = vector.multi_reduction <add>, %22, %cst_15 [1] : vector<1x64xf32> to vector<1xf32>
    %24 = vector.shape_cast %23 : vector<1xf32> to vector<1x1xf32>
    %25 = math.rsqrt %24 : vector<1x1xf32>
    %26 = vector.broadcast %25 : vector<1x1xf32> to vector<1x64xf32>
    %27 = arith.mulf %21, %26 : vector<1x64xf32>
    %28 = vector.broadcast %27 : vector<1x64xf32> to vector<16x64xf32>
    %29 = arith.mulf %20, %28 : vector<16x64xf32>
    %cst_16 = arith.constant dense<0.000000e+00> : vector<16xf32>
    %30 = vector.multi_reduction <add>, %29, %cst_16 [1] : vector<16x64xf32> to vector<16xf32>
    %31 = vector.shape_cast %30 : vector<16xf32> to vector<16x1xf32>
    %32 = math.tanh %31 : vector<16x1xf32>
    %33 = tpu.iota {dimensions = array<i32: 0>} : vector<16x16xi32>
    %34 = tpu.iota {dimensions = array<i32: 1>} : vector<16x16xi32>
    %35 = arith.cmpi eq, %33, %34 : vector<16x16xi32>
    %36 = arith.extui %35 : vector<16x16xi1> to vector<16x16xi32>
    %37 = arith.sitofp %36 : vector<16x16xi32> to vector<16x16xf32>
    %38 = vector.broadcast %32 : vector<16x1xf32> to vector<16x16xf32>
    %39 = arith.mulf %37, %38 : vector<16x16xf32>
    %cst_17 = arith.constant dense<0.000000e+00> : vector<16xf32>
    %40 = vector.multi_reduction <add>, %39, %cst_17 [0] : vector<16x16xf32> to vector<16xf32>
    %41 = vector.shape_cast %40 : vector<16xf32> to vector<1x16xf32>
    %42 = vector.broadcast %32 : vector<16x1xf32> to vector<16x16xf32>
    %43 = vector.broadcast %41 : vector<1x16xf32> to vector<16x16xf32>
    %44 = arith.cmpf ogt, %42, %43 : vector<16x16xf32>
    %45 = vector.broadcast %32 : vector<16x1xf32> to vector<16x16xf32>
    %46 = vector.broadcast %41 : vector<1x16xf32> to vector<16x16xf32>
    %47 = arith.cmpf oeq, %45, %46 : vector<16x16xf32>
    %48 = arith.cmpi slt, %33, %34 : vector<16x16xi32>
    %49 = arith.andi %47, %48 : vector<16x16xi1>
    %50 = arith.ori %44, %49 : vector<16x16xi1>
    %51 = arith.extui %50 : vector<16x16xi1> to vector<16x16xi32>
    %52 = arith.sitofp %51 : vector<16x16xi32> to vector<16x16xf32>
    %cst_18 = arith.constant dense<0.000000e+00> : vector<16xf32>
    %53 = vector.multi_reduction <add>, %52, %cst_18 [0] : vector<16x16xf32> to vector<16xf32>
    %54 = vector.shape_cast %53 : vector<16xf32> to vector<1x16xf32>
    %55 = arith.fptosi %54 : vector<1x16xf32> to vector<1x16xi32>
    %56 = tpu.iota {dimensions = array<i32: 0>} : vector<8x16xi32>
    %57 = vector.broadcast %55 : vector<1x16xi32> to vector<8x16xi32>
    %58 = arith.cmpi eq, %56, %57 : vector<8x16xi32>
    %59 = arith.extui %58 : vector<8x16xi1> to vector<8x16xi32>
    %60 = arith.sitofp %59 : vector<8x16xi32> to vector<8x16xf32>
    %61 = vector.broadcast %32 : vector<16x1xf32> to vector<16x64xf32>
    %62 = arith.mulf %20, %61 : vector<16x64xf32>
    %cst_19 = arith.constant dense<0.000000e+00> : vector<8x64xf32>
    %63 = tpu.matmul %60, %62, %cst_19 {dimension_numbers = #tpu.dot_dimension_numbers<[1], [0], [0], [1], [0, 0, 1, 1], [], []>} : vector<8x16xf32>, vector<16x64xf32>, vector<8x64xf32> -> vector<8x64xf32>
    %cst_20 = arith.constant dense<0.000000e+00> : vector<8x16xf32>
    %64 = tpu.matmul %60, %3, %cst_20 {dimension_numbers = #tpu.dot_dimension_numbers<[1], [0], [0], [1], [0, 0, 1, 1], [], []>} : vector<8x16xf32>, vector<16x16xf32>, vector<8x16xf32> -> vector<8x16xf32>
    %cst_21 = arith.constant dense<0.000000e+00> : vector<8x8xf32>
    %65 = tpu.matmul %64, %60, %cst_21 {dimension_numbers = #tpu.dot_dimension_numbers<[1], [1], [0], [0], [0, 0, 1, 0], [], []>} : vector<8x16xf32>, vector<8x16xf32>, vector<8x8xf32> -> vector<8x8xf32>
    %cst_22 = arith.constant dense<0xFF800000> : vector<64xf32>
    %66 = vector.multi_reduction <maximumf>, %63, %cst_22 [0] : vector<8x64xf32> to vector<64xf32>
    %67 = vector.shape_cast %66 : vector<64xf32> to vector<1x64xf32>
    %cst_23 = arith.constant dense<0.000000e+00> : vector<64xf32>
    %68 = vector.multi_reduction <add>, %63, %cst_23 [0] : vector<8x64xf32> to vector<64xf32>
    %69 = vector.shape_cast %68 : vector<64xf32> to vector<1x64xf32>
    %cst_24 = arith.constant 1.250000e-01 : f32
    %70 = vector.broadcast %cst_24 : f32 to vector<1x64xf32>
    %71 = arith.mulf %69, %70 : vector<1x64xf32>
    %c24 = arith.constant 24 : index
    %c0_25 = arith.constant 0 : index
    %72 = vector.load %arg4[%c24, %c0_25] : memref<336x64xf32, #tpu.memory_space<vmem>>, vector<64x64xf32>
    %c88 = arith.constant 88 : index
    %c0_26 = arith.constant 0 : index
    %73 = vector.load %arg4[%c88, %c0_26] : memref<336x64xf32, #tpu.memory_space<vmem>>, vector<64x64xf32>
    %c152 = arith.constant 152 : index
    %c0_27 = arith.constant 0 : index
    %74 = vector.load %arg4[%c152, %c0_27] : memref<336x64xf32, #tpu.memory_space<vmem>>, vector<1x64xf32>
    %cst_28 = arith.constant dense<0.000000e+00> : vector<8xf32>
    %75 = vector.multi_reduction <add>, %65, %cst_28 [1] : vector<8x8xf32> to vector<8xf32>
    %76 = vector.shape_cast %75 : vector<8xf32> to vector<8x1xf32>
    %cst_29 = arith.constant 1.000000e+00 : f32
    %77 = vector.broadcast %cst_29 : f32 to vector<8x1xf32>
    %78 = arith.maximumf %76, %77 : vector<8x1xf32>
    %79 = vector.broadcast %78 : vector<8x1xf32> to vector<8x8xf32>
    %80 = arith.divf %65, %79 : vector<8x8xf32>
    %cst_30 = arith.constant dense<0.000000e+00> : vector<8x64xf32>
    %81 = tpu.matmul %80, %63, %cst_30 {dimension_numbers = #tpu.dot_dimension_numbers<[1], [0], [0], [1], [0, 0, 1, 1], [], []>} : vector<8x8xf32>, vector<8x64xf32>, vector<8x64xf32> -> vector<8x64xf32>
    %cst_31 = arith.constant dense<0.000000e+00> : vector<8x64xf32>
    %82 = tpu.matmul %81, %72, %cst_31 {dimension_numbers = #tpu.dot_dimension_numbers<[1], [0], [0], [1], [0, 0, 1, 1], [], []>} : vector<8x64xf32>, vector<64x64xf32>, vector<8x64xf32> -> vector<8x64xf32>
    %cst_32 = arith.constant dense<0.000000e+00> : vector<8x64xf32>
    %83 = tpu.matmul %63, %73, %cst_32 {dimension_numbers = #tpu.dot_dimension_numbers<[1], [0], [0], [1], [0, 0, 1, 1], [], []>} : vector<8x64xf32>, vector<64x64xf32>, vector<8x64xf32> -> vector<8x64xf32>
    %84 = arith.addf %82, %83 : vector<8x64xf32>
    %85 = vector.broadcast %74 : vector<1x64xf32> to vector<8x64xf32>
    %86 = arith.addf %84, %85 : vector<8x64xf32>
    %cst_33 = arith.constant 0.000000e+00 : f32
    %87 = vector.broadcast %cst_33 : f32 to vector<8x64xf32>
    %88 = arith.maximumf %86, %87 : vector<8x64xf32>
    %c312 = arith.constant 312 : index
    %c0_34 = arith.constant 0 : index
    %89 = vector.load %arg4[%c312, %c0_34] : memref<336x64xf32, #tpu.memory_space<vmem>>, vector<1x64xf32>
    %90 = arith.mulf %89, %89 : vector<1x64xf32>
    %cst_35 = arith.constant dense<0.000000e+00> : vector<1xf32>
    %91 = vector.multi_reduction <add>, %90, %cst_35 [1] : vector<1x64xf32> to vector<1xf32>
    %92 = vector.shape_cast %91 : vector<1xf32> to vector<1x1xf32>
    %93 = math.rsqrt %92 : vector<1x1xf32>
    %94 = vector.broadcast %93 : vector<1x1xf32> to vector<1x64xf32>
    %95 = arith.mulf %89, %94 : vector<1x64xf32>
    %96 = vector.broadcast %95 : vector<1x64xf32> to vector<8x64xf32>
    %97 = arith.mulf %88, %96 : vector<8x64xf32>
    %cst_36 = arith.constant dense<0.000000e+00> : vector<8xf32>
    %98 = vector.multi_reduction <add>, %97, %cst_36 [1] : vector<8x64xf32> to vector<8xf32>
    %99 = vector.shape_cast %98 : vector<8xf32> to vector<8x1xf32>
    %100 = math.tanh %99 : vector<8x1xf32>
    %101 = tpu.iota {dimensions = array<i32: 0>} : vector<8x8xi32>
    %102 = tpu.iota {dimensions = array<i32: 1>} : vector<8x8xi32>
    %103 = arith.cmpi eq, %101, %102 : vector<8x8xi32>
    %104 = arith.extui %103 : vector<8x8xi1> to vector<8x8xi32>
    %105 = arith.sitofp %104 : vector<8x8xi32> to vector<8x8xf32>
    %106 = vector.broadcast %100 : vector<8x1xf32> to vector<8x8xf32>
    %107 = arith.mulf %105, %106 : vector<8x8xf32>
    %cst_37 = arith.constant dense<0.000000e+00> : vector<8xf32>
    %108 = vector.multi_reduction <add>, %107, %cst_37 [0] : vector<8x8xf32> to vector<8xf32>
    %109 = vector.shape_cast %108 : vector<8xf32> to vector<1x8xf32>
    %110 = vector.broadcast %100 : vector<8x1xf32> to vector<8x8xf32>
    %111 = vector.broadcast %109 : vector<1x8xf32> to vector<8x8xf32>
    %112 = arith.cmpf ogt, %110, %111 : vector<8x8xf32>
    %113 = vector.broadcast %100 : vector<8x1xf32> to vector<8x8xf32>
    %114 = vector.broadcast %109 : vector<1x8xf32> to vector<8x8xf32>
    %115 = arith.cmpf oeq, %113, %114 : vector<8x8xf32>
    %116 = arith.cmpi slt, %101, %102 : vector<8x8xi32>
    %117 = arith.andi %115, %116 : vector<8x8xi1>
    %118 = arith.ori %112, %117 : vector<8x8xi1>
    %119 = arith.extui %118 : vector<8x8xi1> to vector<8x8xi32>
    %120 = arith.sitofp %119 : vector<8x8xi32> to vector<8x8xf32>
    %cst_38 = arith.constant dense<0.000000e+00> : vector<8xf32>
    %121 = vector.multi_reduction <add>, %120, %cst_38 [0] : vector<8x8xf32> to vector<8xf32>
    %122 = vector.shape_cast %121 : vector<8xf32> to vector<1x8xf32>
    %123 = arith.fptosi %122 : vector<1x8xf32> to vector<1x8xi32>
    %124 = tpu.iota {dimensions = array<i32: 0>} : vector<4x8xi32>
    %125 = vector.broadcast %123 : vector<1x8xi32> to vector<4x8xi32>
    %126 = arith.cmpi eq, %124, %125 : vector<4x8xi32>
    %127 = arith.extui %126 : vector<4x8xi1> to vector<4x8xi32>
    %128 = arith.sitofp %127 : vector<4x8xi32> to vector<4x8xf32>
    %129 = vector.broadcast %100 : vector<8x1xf32> to vector<8x64xf32>
    %130 = arith.mulf %88, %129 : vector<8x64xf32>
    %cst_39 = arith.constant dense<0.000000e+00> : vector<4x64xf32>
    %131 = tpu.matmul %128, %130, %cst_39 {dimension_numbers = #tpu.dot_dimension_numbers<[1], [0], [0], [1], [0, 0, 1, 1], [], []>} : vector<4x8xf32>, vector<8x64xf32>, vector<4x64xf32> -> vector<4x64xf32>
    %cst_40 = arith.constant dense<0.000000e+00> : vector<4x8xf32>
    %132 = tpu.matmul %128, %65, %cst_40 {dimension_numbers = #tpu.dot_dimension_numbers<[1], [0], [0], [1], [0, 0, 1, 1], [], []>} : vector<4x8xf32>, vector<8x8xf32>, vector<4x8xf32> -> vector<4x8xf32>
    %cst_41 = arith.constant dense<0.000000e+00> : vector<4x4xf32>
    %133 = tpu.matmul %132, %128, %cst_41 {dimension_numbers = #tpu.dot_dimension_numbers<[1], [1], [0], [0], [0, 0, 1, 0], [], []>} : vector<4x8xf32>, vector<4x8xf32>, vector<4x4xf32> -> vector<4x4xf32>
    %cst_42 = arith.constant dense<0xFF800000> : vector<64xf32>
    %134 = vector.multi_reduction <maximumf>, %131, %cst_42 [0] : vector<4x64xf32> to vector<64xf32>
    %135 = vector.shape_cast %134 : vector<64xf32> to vector<1x64xf32>
    %cst_43 = arith.constant dense<0.000000e+00> : vector<64xf32>
    %136 = vector.multi_reduction <add>, %131, %cst_43 [0] : vector<4x64xf32> to vector<64xf32>
    %137 = vector.shape_cast %136 : vector<64xf32> to vector<1x64xf32>
    %cst_44 = arith.constant 2.500000e-01 : f32
    %138 = vector.broadcast %cst_44 : f32 to vector<1x64xf32>
    %139 = arith.mulf %137, %138 : vector<1x64xf32>
    %140 = arith.addf %67, %135 : vector<1x64xf32>
    %141 = arith.addf %71, %139 : vector<1x64xf32>
    %c160 = arith.constant 160 : index
    %c0_45 = arith.constant 0 : index
    %142 = vector.load %arg4[%c160, %c0_45] : memref<336x64xf32, #tpu.memory_space<vmem>>, vector<64x64xf32>
    %c224 = arith.constant 224 : index
    %c0_46 = arith.constant 0 : index
    %143 = vector.load %arg4[%c224, %c0_46] : memref<336x64xf32, #tpu.memory_space<vmem>>, vector<1x64xf32>
    %144 = tpu.iota {dimensions = array<i32: 0>} : vector<4x4xi32>
    %145 = tpu.iota {dimensions = array<i32: 1>} : vector<4x4xi32>
    %146 = arith.cmpi eq, %144, %145 : vector<4x4xi32>
    %147 = arith.extui %146 : vector<4x4xi1> to vector<4x4xi32>
    %148 = arith.sitofp %147 : vector<4x4xi32> to vector<4x4xf32>
    %149 = arith.addf %133, %148 : vector<4x4xf32>
    %cst_47 = arith.constant dense<0.000000e+00> : vector<4xf32>
    %150 = vector.multi_reduction <add>, %149, %cst_47 [1] : vector<4x4xf32> to vector<4xf32>
    %151 = vector.shape_cast %150 : vector<4xf32> to vector<4x1xf32>
    %152 = math.rsqrt %151 : vector<4x1xf32>
    %cst_48 = arith.constant dense<0.000000e+00> : vector<4x64xf32>
    %153 = tpu.matmul %131, %142, %cst_48 {dimension_numbers = #tpu.dot_dimension_numbers<[1], [0], [0], [1], [0, 0, 1, 1], [], []>} : vector<4x64xf32>, vector<64x64xf32>, vector<4x64xf32> -> vector<4x64xf32>
    %154 = vector.broadcast %152 : vector<4x1xf32> to vector<4x64xf32>
    %155 = arith.mulf %154, %153 : vector<4x64xf32>
    %cst_49 = arith.constant dense<0.000000e+00> : vector<4x64xf32>
    %156 = tpu.matmul %149, %155, %cst_49 {dimension_numbers = #tpu.dot_dimension_numbers<[1], [0], [0], [1], [0, 0, 1, 1], [], []>} : vector<4x4xf32>, vector<4x64xf32>, vector<4x64xf32> -> vector<4x64xf32>
    %157 = vector.broadcast %152 : vector<4x1xf32> to vector<4x64xf32>
    %158 = arith.mulf %157, %156 : vector<4x64xf32>
    %159 = vector.broadcast %143 : vector<1x64xf32> to vector<4x64xf32>
    %160 = arith.addf %158, %159 : vector<4x64xf32>
    %cst_50 = arith.constant 0.000000e+00 : f32
    %161 = vector.broadcast %cst_50 : f32 to vector<4x64xf32>
    %162 = arith.maximumf %160, %161 : vector<4x64xf32>
    %c320 = arith.constant 320 : index
    %c0_51 = arith.constant 0 : index
    %163 = vector.load %arg4[%c320, %c0_51] : memref<336x64xf32, #tpu.memory_space<vmem>>, vector<1x64xf32>
    %164 = arith.mulf %163, %163 : vector<1x64xf32>
    %cst_52 = arith.constant dense<0.000000e+00> : vector<1xf32>
    %165 = vector.multi_reduction <add>, %164, %cst_52 [1] : vector<1x64xf32> to vector<1xf32>
    %166 = vector.shape_cast %165 : vector<1xf32> to vector<1x1xf32>
    %167 = math.rsqrt %166 : vector<1x1xf32>
    %168 = vector.broadcast %167 : vector<1x1xf32> to vector<1x64xf32>
    %169 = arith.mulf %163, %168 : vector<1x64xf32>
    %170 = vector.broadcast %169 : vector<1x64xf32> to vector<4x64xf32>
    %171 = arith.mulf %162, %170 : vector<4x64xf32>
    %cst_53 = arith.constant dense<0.000000e+00> : vector<4xf32>
    %172 = vector.multi_reduction <add>, %171, %cst_53 [1] : vector<4x64xf32> to vector<4xf32>
    %173 = vector.shape_cast %172 : vector<4xf32> to vector<4x1xf32>
    %174 = math.tanh %173 : vector<4x1xf32>
    %175 = tpu.iota {dimensions = array<i32: 0>} : vector<4x4xi32>
    %176 = tpu.iota {dimensions = array<i32: 1>} : vector<4x4xi32>
    %177 = arith.cmpi eq, %175, %176 : vector<4x4xi32>
    %178 = arith.extui %177 : vector<4x4xi1> to vector<4x4xi32>
    %179 = arith.sitofp %178 : vector<4x4xi32> to vector<4x4xf32>
    %180 = vector.broadcast %174 : vector<4x1xf32> to vector<4x4xf32>
    %181 = arith.mulf %179, %180 : vector<4x4xf32>
    %cst_54 = arith.constant dense<0.000000e+00> : vector<4xf32>
    %182 = vector.multi_reduction <add>, %181, %cst_54 [0] : vector<4x4xf32> to vector<4xf32>
    %183 = vector.shape_cast %182 : vector<4xf32> to vector<1x4xf32>
    %184 = vector.broadcast %174 : vector<4x1xf32> to vector<4x4xf32>
    %185 = vector.broadcast %183 : vector<1x4xf32> to vector<4x4xf32>
    %186 = arith.cmpf ogt, %184, %185 : vector<4x4xf32>
    %187 = vector.broadcast %174 : vector<4x1xf32> to vector<4x4xf32>
    %188 = vector.broadcast %183 : vector<1x4xf32> to vector<4x4xf32>
    %189 = arith.cmpf oeq, %187, %188 : vector<4x4xf32>
    %190 = arith.cmpi slt, %175, %176 : vector<4x4xi32>
    %191 = arith.andi %189, %190 : vector<4x4xi1>
    %192 = arith.ori %186, %191 : vector<4x4xi1>
    %193 = arith.extui %192 : vector<4x4xi1> to vector<4x4xi32>
    %194 = arith.sitofp %193 : vector<4x4xi32> to vector<4x4xf32>
    %cst_55 = arith.constant dense<0.000000e+00> : vector<4xf32>
    %195 = vector.multi_reduction <add>, %194, %cst_55 [0] : vector<4x4xf32> to vector<4xf32>
    %196 = vector.shape_cast %195 : vector<4xf32> to vector<1x4xf32>
    %197 = arith.fptosi %196 : vector<1x4xf32> to vector<1x4xi32>
    %198 = tpu.iota {dimensions = array<i32: 0>} : vector<2x4xi32>
    %199 = vector.broadcast %197 : vector<1x4xi32> to vector<2x4xi32>
    %200 = arith.cmpi eq, %198, %199 : vector<2x4xi32>
    %201 = arith.extui %200 : vector<2x4xi1> to vector<2x4xi32>
    %202 = arith.sitofp %201 : vector<2x4xi32> to vector<2x4xf32>
    %203 = vector.broadcast %174 : vector<4x1xf32> to vector<4x64xf32>
    %204 = arith.mulf %162, %203 : vector<4x64xf32>
    %cst_56 = arith.constant dense<0.000000e+00> : vector<2x64xf32>
    %205 = tpu.matmul %202, %204, %cst_56 {dimension_numbers = #tpu.dot_dimension_numbers<[1], [0], [0], [1], [0, 0, 1, 1], [], []>} : vector<2x4xf32>, vector<4x64xf32>, vector<2x64xf32> -> vector<2x64xf32>
    %cst_57 = arith.constant dense<0.000000e+00> : vector<2x4xf32>
    %206 = tpu.matmul %202, %133, %cst_57 {dimension_numbers = #tpu.dot_dimension_numbers<[1], [0], [0], [1], [0, 0, 1, 1], [], []>} : vector<2x4xf32>, vector<4x4xf32>, vector<2x4xf32> -> vector<2x4xf32>
    %cst_58 = arith.constant dense<0.000000e+00> : vector<2x2xf32>
    %207 = tpu.matmul %206, %202, %cst_58 {dimension_numbers = #tpu.dot_dimension_numbers<[1], [1], [0], [0], [0, 0, 1, 0], [], []>} : vector<2x4xf32>, vector<2x4xf32>, vector<2x2xf32> -> vector<2x2xf32>
    %cst_59 = arith.constant dense<0xFF800000> : vector<64xf32>
    %208 = vector.multi_reduction <maximumf>, %205, %cst_59 [0] : vector<2x64xf32> to vector<64xf32>
    %209 = vector.shape_cast %208 : vector<64xf32> to vector<1x64xf32>
    %cst_60 = arith.constant dense<0.000000e+00> : vector<64xf32>
    %210 = vector.multi_reduction <add>, %205, %cst_60 [0] : vector<2x64xf32> to vector<64xf32>
    %211 = vector.shape_cast %210 : vector<64xf32> to vector<1x64xf32>
    %cst_61 = arith.constant 5.000000e-01 : f32
    %212 = vector.broadcast %cst_61 : f32 to vector<1x64xf32>
    %213 = arith.mulf %211, %212 : vector<1x64xf32>
    %214 = arith.addf %140, %209 : vector<1x64xf32>
    %215 = arith.addf %141, %213 : vector<1x64xf32>
    %c232 = arith.constant 232 : index
    %c0_62 = arith.constant 0 : index
    %216 = vector.load %arg4[%c232, %c0_62] : memref<336x64xf32, #tpu.memory_space<vmem>>, vector<64x64xf32>
    %c296 = arith.constant 296 : index
    %c0_63 = arith.constant 0 : index
    %217 = vector.load %arg4[%c296, %c0_63] : memref<336x64xf32, #tpu.memory_space<vmem>>, vector<1x64xf32>
    %218 = tpu.iota {dimensions = array<i32: 0>} : vector<2x2xi32>
    %219 = tpu.iota {dimensions = array<i32: 1>} : vector<2x2xi32>
    %220 = arith.cmpi eq, %218, %219 : vector<2x2xi32>
    %221 = arith.extui %220 : vector<2x2xi1> to vector<2x2xi32>
    %222 = arith.sitofp %221 : vector<2x2xi32> to vector<2x2xf32>
    %223 = arith.addf %207, %222 : vector<2x2xf32>
    %cst_64 = arith.constant dense<0.000000e+00> : vector<2xf32>
    %224 = vector.multi_reduction <add>, %223, %cst_64 [1] : vector<2x2xf32> to vector<2xf32>
    %225 = vector.shape_cast %224 : vector<2xf32> to vector<2x1xf32>
    %226 = math.rsqrt %225 : vector<2x1xf32>
    %cst_65 = arith.constant dense<0.000000e+00> : vector<2x64xf32>
    %227 = tpu.matmul %205, %216, %cst_65 {dimension_numbers = #tpu.dot_dimension_numbers<[1], [0], [0], [1], [0, 0, 1, 1], [], []>} : vector<2x64xf32>, vector<64x64xf32>, vector<2x64xf32> -> vector<2x64xf32>
    %228 = vector.broadcast %226 : vector<2x1xf32> to vector<2x64xf32>
    %229 = arith.mulf %228, %227 : vector<2x64xf32>
    %cst_66 = arith.constant dense<0.000000e+00> : vector<2x64xf32>
    %230 = tpu.matmul %223, %229, %cst_66 {dimension_numbers = #tpu.dot_dimension_numbers<[1], [0], [0], [1], [0, 0, 1, 1], [], []>} : vector<2x2xf32>, vector<2x64xf32>, vector<2x64xf32> -> vector<2x64xf32>
    %231 = vector.broadcast %226 : vector<2x1xf32> to vector<2x64xf32>
    %232 = arith.mulf %231, %230 : vector<2x64xf32>
    %233 = vector.broadcast %217 : vector<1x64xf32> to vector<2x64xf32>
    %234 = arith.addf %232, %233 : vector<2x64xf32>
    %cst_67 = arith.constant 0.000000e+00 : f32
    %235 = vector.broadcast %cst_67 : f32 to vector<2x64xf32>
    %236 = arith.maximumf %234, %235 : vector<2x64xf32>
    %c328 = arith.constant 328 : index
    %c0_68 = arith.constant 0 : index
    %237 = vector.load %arg4[%c328, %c0_68] : memref<336x64xf32, #tpu.memory_space<vmem>>, vector<1x64xf32>
    %238 = arith.mulf %237, %237 : vector<1x64xf32>
    %cst_69 = arith.constant dense<0.000000e+00> : vector<1xf32>
    %239 = vector.multi_reduction <add>, %238, %cst_69 [1] : vector<1x64xf32> to vector<1xf32>
    %240 = vector.shape_cast %239 : vector<1xf32> to vector<1x1xf32>
    %241 = math.rsqrt %240 : vector<1x1xf32>
    %242 = vector.broadcast %241 : vector<1x1xf32> to vector<1x64xf32>
    %243 = arith.mulf %237, %242 : vector<1x64xf32>
    %244 = vector.broadcast %243 : vector<1x64xf32> to vector<2x64xf32>
    %245 = arith.mulf %236, %244 : vector<2x64xf32>
    %cst_70 = arith.constant dense<0.000000e+00> : vector<2xf32>
    %246 = vector.multi_reduction <add>, %245, %cst_70 [1] : vector<2x64xf32> to vector<2xf32>
    %247 = vector.shape_cast %246 : vector<2xf32> to vector<2x1xf32>
    %248 = math.tanh %247 : vector<2x1xf32>
    %249 = tpu.iota {dimensions = array<i32: 0>} : vector<2x2xi32>
    %250 = tpu.iota {dimensions = array<i32: 1>} : vector<2x2xi32>
    %251 = arith.cmpi eq, %249, %250 : vector<2x2xi32>
    %252 = arith.extui %251 : vector<2x2xi1> to vector<2x2xi32>
    %253 = arith.sitofp %252 : vector<2x2xi32> to vector<2x2xf32>
    %254 = vector.broadcast %248 : vector<2x1xf32> to vector<2x2xf32>
    %255 = arith.mulf %253, %254 : vector<2x2xf32>
    %cst_71 = arith.constant dense<0.000000e+00> : vector<2xf32>
    %256 = vector.multi_reduction <add>, %255, %cst_71 [0] : vector<2x2xf32> to vector<2xf32>
    %257 = vector.shape_cast %256 : vector<2xf32> to vector<1x2xf32>
    %258 = vector.broadcast %248 : vector<2x1xf32> to vector<2x2xf32>
    %259 = vector.broadcast %257 : vector<1x2xf32> to vector<2x2xf32>
    %260 = arith.cmpf ogt, %258, %259 : vector<2x2xf32>
    %261 = vector.broadcast %248 : vector<2x1xf32> to vector<2x2xf32>
    %262 = vector.broadcast %257 : vector<1x2xf32> to vector<2x2xf32>
    %263 = arith.cmpf oeq, %261, %262 : vector<2x2xf32>
    %264 = arith.cmpi slt, %249, %250 : vector<2x2xi32>
    %265 = arith.andi %263, %264 : vector<2x2xi1>
    %266 = arith.ori %260, %265 : vector<2x2xi1>
    %267 = arith.extui %266 : vector<2x2xi1> to vector<2x2xi32>
    %268 = arith.sitofp %267 : vector<2x2xi32> to vector<2x2xf32>
    %cst_72 = arith.constant dense<0.000000e+00> : vector<2xf32>
    %269 = vector.multi_reduction <add>, %268, %cst_72 [0] : vector<2x2xf32> to vector<2xf32>
    %270 = vector.shape_cast %269 : vector<2xf32> to vector<1x2xf32>
    %271 = arith.fptosi %270 : vector<1x2xf32> to vector<1x2xi32>
    %272 = tpu.iota {dimensions = array<i32: 0>} : vector<1x2xi32>
    %273 = arith.cmpi eq, %272, %271 : vector<1x2xi32>
    %274 = arith.extui %273 : vector<1x2xi1> to vector<1x2xi32>
    %275 = arith.sitofp %274 : vector<1x2xi32> to vector<1x2xf32>
    %276 = vector.broadcast %248 : vector<2x1xf32> to vector<2x64xf32>
    %277 = arith.mulf %236, %276 : vector<2x64xf32>
    %cst_73 = arith.constant dense<0.000000e+00> : vector<1x64xf32>
    %278 = tpu.matmul %275, %277, %cst_73 {dimension_numbers = #tpu.dot_dimension_numbers<[1], [0], [0], [1], [0, 0, 1, 1], [], []>} : vector<1x2xf32>, vector<2x64xf32>, vector<1x64xf32> -> vector<1x64xf32>
    %cst_74 = arith.constant dense<0xFF800000> : vector<64xf32>
    %279 = vector.multi_reduction <maximumf>, %278, %cst_74 [0] : vector<1x64xf32> to vector<64xf32>
    %280 = vector.shape_cast %279 : vector<64xf32> to vector<1x64xf32>
    %cst_75 = arith.constant dense<0.000000e+00> : vector<64xf32>
    %281 = vector.multi_reduction <add>, %278, %cst_75 [0] : vector<1x64xf32> to vector<64xf32>
    %282 = vector.shape_cast %281 : vector<64xf32> to vector<1x64xf32>
    %cst_76 = arith.constant 1.000000e+00 : f32
    %283 = vector.broadcast %cst_76 : f32 to vector<1x64xf32>
    %284 = arith.mulf %282, %283 : vector<1x64xf32>
    %285 = arith.addf %214, %280 : vector<1x64xf32>
    %286 = arith.addf %215, %284 : vector<1x64xf32>
    %c0_77 = arith.constant 0 : index
    %c0_78 = arith.constant 0 : index
    %287 = vector.load %arg5[%c0_77, %c0_78] : memref<416x128xf32, #tpu.memory_space<vmem>>, vector<64x128xf32>
    %cst_79 = arith.constant dense<0.000000e+00> : vector<1x128xf32>
    %288 = tpu.matmul %285, %287, %cst_79 {dimension_numbers = #tpu.dot_dimension_numbers<[1], [0], [0], [1], [0, 0, 1, 1], [], []>} : vector<1x64xf32>, vector<64x128xf32>, vector<1x128xf32> -> vector<1x128xf32>
    %c64 = arith.constant 64 : index
    %c0_80 = arith.constant 0 : index
    %289 = vector.load %arg5[%c64, %c0_80] : memref<416x128xf32, #tpu.memory_space<vmem>>, vector<64x128xf32>
    %cst_81 = arith.constant dense<0.000000e+00> : vector<1x128xf32>
    %290 = tpu.matmul %286, %289, %cst_81 {dimension_numbers = #tpu.dot_dimension_numbers<[1], [0], [0], [1], [0, 0, 1, 1], [], []>} : vector<1x64xf32>, vector<64x128xf32>, vector<1x128xf32> -> vector<1x128xf32>
    %291 = arith.addf %288, %290 : vector<1x128xf32>
    %c0_82 = arith.constant 0 : index
    %c0_83 = arith.constant 0 : index
    %c0_84 = arith.constant 0 : index
    %292 = vector.load %arg3[%c0_82, %c0_83, %c0_84] : memref<1x1x8xf32, #tpu.memory_space<vmem>>, vector<1x1x8xf32>
    %293 = vector.shape_cast %292 : vector<1x1x8xf32> to vector<1x8xf32>
    %c128 = arith.constant 128 : index
    %c0_85 = arith.constant 0 : index
    %294 = vector.load %arg5[%c128, %c0_85] : memref<416x128xf32, #tpu.memory_space<vmem>>, vector<8x128xf32>
    %cst_86 = arith.constant dense<0.000000e+00> : vector<1x128xf32>
    %295 = tpu.matmul %293, %294, %cst_86 {dimension_numbers = #tpu.dot_dimension_numbers<[1], [0], [0], [1], [0, 0, 1, 1], [], []>} : vector<1x8xf32>, vector<8x128xf32>, vector<1x128xf32> -> vector<1x128xf32>
    %296 = arith.addf %291, %295 : vector<1x128xf32>
    %c136 = arith.constant 136 : index
    %c0_87 = arith.constant 0 : index
    %297 = vector.load %arg5[%c136, %c0_87] : memref<416x128xf32, #tpu.memory_space<vmem>>, vector<1x128xf32>
    %298 = arith.addf %296, %297 : vector<1x128xf32>
    %cst_88 = arith.constant 0.000000e+00 : f32
    %299 = vector.broadcast %cst_88 : f32 to vector<1x128xf32>
    %300 = arith.maximumf %298, %299 : vector<1x128xf32>
    %c144 = arith.constant 144 : index
    %c0_89 = arith.constant 0 : index
    %301 = vector.load %arg5[%c144, %c0_89] : memref<416x128xf32, #tpu.memory_space<vmem>>, vector<128x128xf32>
    %cst_90 = arith.constant dense<0.000000e+00> : vector<1x128xf32>
    %302 = tpu.matmul %300, %301, %cst_90 {dimension_numbers = #tpu.dot_dimension_numbers<[1], [0], [0], [1], [0, 0, 1, 1], [], []>} : vector<1x128xf32>, vector<128x128xf32>, vector<1x128xf32> -> vector<1x128xf32>
    %c272 = arith.constant 272 : index
    %c0_91 = arith.constant 0 : index
    %303 = vector.load %arg5[%c272, %c0_91] : memref<416x128xf32, #tpu.memory_space<vmem>>, vector<1x128xf32>
    %304 = arith.addf %302, %303 : vector<1x128xf32>
    %cst_92 = arith.constant 0.000000e+00 : f32
    %305 = vector.broadcast %cst_92 : f32 to vector<1x128xf32>
    %306 = arith.maximumf %304, %305 : vector<1x128xf32>
    %c280 = arith.constant 280 : index
    %c0_93 = arith.constant 0 : index
    %307 = vector.load %arg5[%c280, %c0_93] : memref<416x128xf32, #tpu.memory_space<vmem>>, vector<128x128xf32>
    %cst_94 = arith.constant dense<0.000000e+00> : vector<1x128xf32>
    %308 = tpu.matmul %306, %307, %cst_94 {dimension_numbers = #tpu.dot_dimension_numbers<[1], [0], [0], [1], [0, 0, 1, 1], [], []>} : vector<1x128xf32>, vector<128x128xf32>, vector<1x128xf32> -> vector<1x128xf32>
    %c408 = arith.constant 408 : index
    %c0_95 = arith.constant 0 : index
    %309 = vector.load %arg5[%c408, %c0_95] : memref<416x128xf32, #tpu.memory_space<vmem>>, vector<1x128xf32>
    %310 = arith.addf %308, %309 : vector<1x128xf32>
    %311 = vector.extract_strided_slice %310 {offsets = [0, 0], sizes = [1, 1], strides = [1, 1]} : vector<1x128xf32> to vector<1x1xf32>
    %c0_96 = arith.constant 0 : index
    %c0_97 = arith.constant 0 : index
    %c0_98 = arith.constant 0 : index
    %312 = vector.load %arg6[%c0_96, %c0_97, %c0_98] : memref<1x1x1xf32, #tpu.memory_space<vmem>>, vector<1x1x1xf32>
    %313 = vector.shape_cast %312 : vector<1x1x1xf32> to vector<1x1xf32>
    %314 = vector.shape_cast %311 : vector<1x1xf32> to vector<1x1x1xf32>
    tpu.vector_store %arg6[%c0_96, %c0_97, %c0_98], %314 {strides = array<i32>} : memref<1x1x1xf32, #tpu.memory_space<vmem>>, vector<1x1x1xf32>,
    return
  }
  func.func @transform_0(%arg0: i32) -> (i32, i32, i32) {
    %c0_i32 = arith.constant 0 : i32
    %c0_i32_0 = arith.constant 0 : i32
    %c0_i32_1 = arith.constant 0 : i32
    return %arg0, %c0_i32, %c0_i32_0 : i32, i32, i32
  }
  func.func @transform_1(%arg0: i32) -> (i32, i32, i32) {
    %c0_i32 = arith.constant 0 : i32
    %c0_i32_0 = arith.constant 0 : i32
    %c0_i32_1 = arith.constant 0 : i32
    return %arg0, %c0_i32, %c0_i32_0 : i32, i32, i32
  }
  func.func @transform_2(%arg0: i32) -> (i32, i32, i32) {
    %c0_i32 = arith.constant 0 : i32
    %c0_i32_0 = arith.constant 0 : i32
    %c0_i32_1 = arith.constant 0 : i32
    return %arg0, %c0_i32, %c0_i32_0 : i32, i32, i32
  }
  func.func @transform_3(%arg0: i32) -> (i32, i32) {
    %c0_i32 = arith.constant 0 : i32
    %c0_i32_0 = arith.constant 0 : i32
    %c0_i32_1 = arith.constant 0 : i32
    return %c0_i32, %c0_i32_0 : i32, i32
  }
  func.func @transform_4(%arg0: i32) -> (i32, i32) {
    %c0_i32 = arith.constant 0 : i32
    %c0_i32_0 = arith.constant 0 : i32
    %c0_i32_1 = arith.constant 0 : i32
    return %c0_i32, %c0_i32_0 : i32, i32
  }
  func.func @transform_5(%arg0: i32) -> (i32, i32, i32) {
    %c0_i32 = arith.constant 0 : i32
    %c0_i32_0 = arith.constant 0 : i32
    %c0_i32_1 = arith.constant 0 : i32
    return %arg0, %c0_i32, %c0_i32_0 : i32, i32, i32
  }
}

</mosaic_0001>

<bundles_post_ra>
// kernel: critic_forward.1
= control target key start
LH: loop header
LB: loop body
LE: loop exit
PB: predicated region body
PF: predicated region fallthrough
CT: control target
= control target key end

     0   :  { %s3285_s18 = smov 0   ;;  %s3846_s0 = inlined_call_operand.vmem [shape: f32[2,16,2], index: 0, kind: input, shape index: {}]   ;;  %s3847_s1 = inlined_call_operand.vmem [shape: f32[2,16,16], index: 1, kind: input, shape index: {}]   ;;  %s3848_s2 = inlined_call_operand.vmem [shape: f32[2,1,8], index: 2, kind: input, shape index: {}]   ;;  %s3849_s3 = inlined_call_operand.vmem [shape: f32[336,64], index: 3, kind: input, shape index: {}]   ;;  %s3850_s4 = inlined_call_operand.vmem [shape: f32[416,128], index: 4, kind: input, shape index: {}]   ;;  %s3851_s5 = inlined_call_operand.vmem [shape: f32[2,1,1], index: 5, kind: output, shape index: {}]  }
   0x1 LB: > { %s2598_s19 = sadd.s32 4294967295, %s3250_s18   ;;  %p2602_p0 = scmp.ge.s32.totalorder %s3250_s18, 1  ;;  %s3250_s18 = sphi %s3285_s18, %s15_s18  }
   0x2   : > { %p205_p1 = scmp.lt.s32.totalorder %s3250_s18, 3 }
   0x4   : > { %p206_p2 = pnand %p2602_p0, %p205_p1 }
   0x5   : > { %p239_p3 = scmp.lt.s32.totalorder (!%p206_p2), %s2598_s19, 1  ;;  %vm262_vm0 = vcmask (!%p206_p2), 130048   ;;  %v260_v7 = vld [vmem:[%s3849_s3 + $0x8] sm:$0x3] (!%p206_p2)  ;;  %vm363_vm1 = vcmask (!%p206_p2), 1041408   ;;  %vm356_vm2 = vcmask (!%p206_p2), 15360   ;;  %v542_v23 = vlaneseq (!%p206_p2) }
   0x6   : > { %209 = sbr.rel (%p206_p2) target bundleno = 4877 (0x130d), region = 40  ;;  %v259_v8 = vld [vmem:[%s3849_s3] sm:$0x3] (!%p206_p2)  ;;  %2797 = vmatprep.subr.msk.mxu1 (!%p206_p2), %vm363_vm1, %v260_v7  ;;  %v534_v17 = vld [vmem:[%s3849_s3 + $0x130] sm:$0x1] (!%p206_p2)  ;;  %vm536_vm3 = vcmask (!%p206_p2), 516096  }
   0x7   : > { %2798 = vmatpush3.msk.msra.mxu1 (!%p206_p2), %vm363_vm1, %v260_v7  ;;  %v535_v18 = vmul.f32 (!%p206_p2), %v534_v17, %v534_v17  ;;  %v3332_v24 = vshrl.u32 (!%p206_p2), %v542_v23, 7  ;;  %v2615_v28 = vld [vmem:[%s3849_s3 + $0x10] ss:$0 sm:$0xff] (!%p206_p2)  ;;  %vm548_vm4 = vcmask (!%p206_p2), 523264   ;;  %v3252_v41 = vmov (!%p206_p2), 0.0|0.0  }
   0x8   : > { %2802 = vmatprep.subr.msk.mxu1 (!%p206_p2), %vm363_vm1, %v259_v8  ;;  %v3253_v42 = vmov (!%p206_p2), 0.0   ;;  %vm3254_vm5 = vmmov (!%p206_p2), 0   ;;  %v3353_v46 = vand.u32 (!%p206_p2), 127, %v542_v23 }
   0x9   : > { %v537_v19 = vsel (!%p206_p2), %vm536_vm3, %v535_v18, 0.0  ;;  %v3335_v27 = vsub.s32 (!%p206_p2), 0, %v3332_v24  ;;  %v559_v45 = vadd.s32 (!%p206_p2), 8, %v3332_v24  ;;  %v849_v18 = vld [vmem:[%s3849_s3 + $0x68] sm:$0xff] (!%p206_p2) }
   0xa   : > { %538 = vadd.xlane.f32.xlu1 (!%p206_p2), %v537_v19  ;;  %vm562_vm7 = vcmp.eq.s32.totalorder (!%p206_p2), %v3332_v24, %v3353_v46  ;;  %vm583_vm8 = vcmp.lt.s32.totalorder (!%p206_p2), %v3332_v24, %v3353_v46  ;;  %v850_v19 = vld [vmem:[%s3849_s3 + $0x70] sm:$0xff] (!%p206_p2) }
   0xb   : > { %vm563_vm6 = vcmp.eq.s32.totalorder (!%p206_p2), %v559_v45, %v3353_v46  ;;  %v3360_v48 = vsel (!%p206_p2), %vm562_vm7, 1.0, %v3253_v42  ;;  %vm584_vm9 = vcmp.lt.s32.totalorder (!%p206_p2), %v559_v45, %v3353_v46  ;;  %v2121_v46 = vld [vmem:[%s3850_s4 + $0x48] sm:$0xff] (!%p206_p2) }
   0xc   : > { %v2617_v47 = vsel (!%p206_p2), %vm563_vm6, 1.0, %v3253_v42 }
   0xd   : > { %s3853_s19 = smov (!%p239_p3, %s2598_s19), 1 }
   0xe   : > { %s2660_s20 = sshll.u32 %s3853_s19, 4  ;;  %s251_s7 = scalar_lea.vmem %s3848_s2, %s3853_s19 }
   0xf   : > { %s248_s23 = scalar_lea.vmem %s3847_s1, %s2660_s20  ;;  %s243_s26 = scalar_lea.vmem %s3846_s0, %s2660_s20 }
  0x10   : > { %v3299_v0 = vld [vmem:[%s248_s23] sm:$0xff]  ;;  %v3301_v1 = vld [vmem:[%s248_s23 + $0x8] sm:$0xff]  ;;  %s254_s11 = scalar_lea.vmem %s3851_s5, %s3853_s19 }
  0x11   : > { %v263_v2 = vsel %vm262_vm0, %v3299_v0, 0.0  ;;  %v266_v3 = vsel %vm262_vm0, %v3301_v1, 0.0  ;;  %v255_v4 = vld [vmem:[%s243_s26] sm:$0xff]  ;;  %v256_v5 = vld [vmem:[%s243_s26 + $0x8] sm:$0xff]  ;;  %v3073_v40 = vpack.c.bf16 %v3301_v1, %v3299_v0 }
  0x12   : > { %264 = vadd.xlane.f32.xlu0 %v263_v2  ;;  %v3065_v6 = vpack.c.bf16 %v256_v5, %v255_v4  ;;  %2799 = vmatprep.mubr.msk.f32.mxu1 %vm356_vm2, %v255_v4 }
  0x13   : > { %2800 = vmatmul.mubr.msk.f32.vlgmr.msra.gmra.mrb[0].mxu1 %vm356_vm2, %v256_v5 }
  0x14   : > { %3066 = vmatprep.subr.bf16.mxu0 %v3065_v6  ;;  %2803 = vmatpush3.msk.msra.mxu1 %vm363_vm1, %v259_v8 }
  0x15   : > { %3068 = vmatpush3.bf16.msra.mxu0 %v3065_v6  ;;  %3072 = vmatprep.subr.bf16.mxu1 %v3252_v41 }
  0x16   : > { %267 = vadd.xlane.f32.xlu0 %v266_v3  ;;  %3069 = vmatprep.subr.bf16.mxu0 %v3252_v41 }
  0x97   : > { %v539_v22 = vpop.xlane.xlu1 %538 }
  0x9f   : > { %v265_v9 = vpop.xlane.xlu0 %264 }
  0xa0   : > { %v269_v10 = vmax.f32 %v265_v9, 1.0 }
  0xa2   : > { %3216 = vrcp.f32 %v269_v10 }
  0xa3   : > { %v268_v11 = vpop.xlane.xlu0 %267 }
  0xa4   : > { %v270_v12 = vmax.f32 %v268_v11, 1.0 }
  0xa6   : > { %3218 = vrcp.f32 %v270_v12 }
  0xa7   : > { %3220 = vrsqrt.f32 %v539_v22 }
  0xac   : > { %v3217_v13 = vpop.eup %3216 }
  0xad   : > { %v272_v14 = vmul.f32 %v3217_v13, %v3299_v0 }
  0xaf   : > { %2794 = vmatprep.mubr.msk.f32.mxu0 %vm262_vm0, %v272_v14 }
  0xb0   : > { %v3219_v15 = vpop.eup %3218 }
  0xb1   : > { %v274_v16 = vmul.f32 %v3219_v15, %v3301_v1  ;;  %v3221_v25 = vpop.eup %3220  ;;  %v847_v15 = vld [vmem:[%s3849_s3 + $0x58] sm:$0xff] }
  0xb2   : > { %v541_v26 = vmul.f32 %v3221_v25, %v534_v17  ;;  %v3079_v25 = vpack.c.bf16 %v850_v19, %v849_v18 }
  0xb3   : > { %2795 = vmatmul.mubr.msk.f32.vlgmr.msra.gmra.mrb[0].mxu0 %vm262_vm0, %v274_v16  ;;  %v848_v16 = vld [vmem:[%s3849_s3 + $0x60] sm:$0xff] }
  0xb4   : > { %v545_v32 = vrot.slane %v541_v26, %v3335_v27  ;;  %2811 = vmatprep.mubr.msk.f32.mxu0 %vm3254_vm5, %v3253_v42  ;;  %v3076_v17 = vpack.c.bf16 %v848_v16, %v847_v15  ;;  %v851_v26 = vld [vmem:[%s3849_s3 + $0x78] sm:$0xff] }
 0x186   : > { %v2796_v20 = vpop.f32.mrb[0].mxu0 }
 0x187   : > { %v347_v21 = vpop.f32.mrb[1].mxu0 }
 0x188   : > { %2804 = vmatprep.mubr.msk.f32.mxu1 %vm356_vm2, %v347_v21 }
 0x189   : > { %2805 = vmatmul.mubr.msk.f32.vlgmr.msra.gmra.mrb[0].mxu1 %vm356_vm2, %v2796_v20 }
 0x18a   : > { %3074 = vmatpush3.bf16.msra.mxu1 %v3073_v40  ;;  %2818 = vmatprep.mubr.msk.f32.mxu1 %vm3254_vm5, %v3253_v42  ;;  %v839_v40 = vld [vmem:[%s3849_s3 + $0x18] sm:$0xff] }
 0x18b   : > { %2826 = vmatprep.subr.mxu1 %v3253_v42 }
 0x25c   : > { %v2806_v29 = vpop.f32.mrb[0].mxu1 }
 0x25d   : > { %v531_v30 = vadd.f32 %v2806_v29, %v2615_v28  ;;  %v517_v31 = vpop.f32.mrb[1].mxu1 }
 0x25e   : > { %v530_v33 = vadd.f32 %v2615_v28, %v517_v31  ;;  %v852_v28 = vld [vmem:[%s3849_s3 + $0x80] sm:$0xff]  ;;  %v854_v31 = vld [vmem:[%s3849_s3 + $0x90] sm:$0xff] }
 0x25f   : > { %v533_v34 = vmax.f32 %v531_v30, 0.0  ;;  %v3082_v29 = vpack.c.bf16 %v852_v28, %v851_v26  ;;  %v853_v30 = vld [vmem:[%s3849_s3 + $0x88] sm:$0xff] }
 0x260   : > { %v532_v35 = vmax.f32 %v530_v33, 0.0 }
 0x261   : > { %v547_v36 = vmul.f32 %v545_v32, %v533_v34 }
 0x262   : > { %v546_v37 = vmul.f32 %v545_v32, %v532_v35  ;;  %v3085_v32 = vpack.c.bf16 %v854_v31, %v853_v30 }
 0x263   : > { %v552_v38 = vsel %vm548_vm4, %v547_v36, 0.0 }
 0x264   : > { %553 = vadd.xlane.f32.xlu0 %v552_v38  ;;  %v549_v39 = vsel %vm548_vm4, %v546_v37, 0.0 }
 0x265   : > { %550 = vadd.xlane.f32.xlu1 %v549_v39 }
 0x2f1   : > { %v554_v43 = vpop.xlane.xlu0 %553 }
 0x2f2   : > { %3222 = vtanh.f32 %v554_v43  ;;  %v551_v44 = vpop.xlane.xlu1 %550  ;;  %v840_v43 = vld [vmem:[%s3849_s3 + $0x20] sm:$0xff] }
 0x2f3   : > { %3224 = vtanh.f32 %v551_v44  ;;  %v3088_v45 = vpack.c.bf16 %v840_v43, %v839_v40 }
 0x2fc   : > { %v3223_v49 = vpop.eup %3222 }
 0x2fd   : > { %v3225_v50 = vpop.eup %3224  ;;  %v607_v51 = vmul.f32 %v3223_v49, %v533_v34  ;;  %v569_v52 = vmul.f32 %v3223_v49, %v2617_v47 }
 0x2fe   : > { %v606_v53 = vmul.f32 %v3225_v50, %v532_v35  ;;  %v568_v54 = vmul.f32 %v3225_v50, %v3360_v48 }
 0x2ff   : > { %v571_v55 = vsel %vm262_vm0, %v569_v52, 0.0  ;;  %v843_v52 = vld [vmem:[%s3849_s3 + $0x38] sm:$0xff] }
 0x300   : > { %v3070_v56 = vpack.c.bf16 %v607_v51, %v606_v53  ;;  %v570_v57 = vsel %vm262_vm0, %v568_v54, 0.0  ;;  %v844_v53 = vld [vmem:[%s3849_s3 + $0x40] sm:$0xff] }
 0x301   : > { %v572_v58 = vadd.f32 %v571_v55, %v570_v57  ;;  %v3094_v54 = vpack.c.bf16 %v844_v53, %v843_v52  ;;  %v845_v55 = vld [vmem:[%s3849_s3 + $0x48] sm:$0xff] }
 0x302   : > { %3071 = vmatpush3.bf16.msra.mxu0 %v3070_v56  ;;  %v846_v56 = vld [vmem:[%s3849_s3 + $0x50] sm:$0xff] }
 0x303   : > { %2821 = vmatprep.subr.mxu0 %v3253_v42  ;;  %v573_v59 = vrot.slane %v572_v58, 4  ;;  %v3097_v57 = vpack.c.bf16 %v846_v56, %v845_v55 }
 0x305   : > { %v574_v60 = vadd.f32 %v573_v59, %v572_v58  ;;  %v1088_v58 = vld [vmem:[%s3849_s3 + $0x138] sm:$0x1] }
 0x306   : > { %v1089_v59 = vmul.f32 %v1088_v58, %v1088_v58 }
 0x307   : > { %v575_v61 = vrot.slane %v574_v60, 2 }
 0x309   : > { %v576_v62 = vadd.f32 %v575_v61, %v574_v60  ;;  %v1090_v60 = vsel %vm536_vm3, %v1089_v59, 0.0 }
 0x30a   : > { %1091 = vadd.xlane.f32.xlu0 %v1090_v60 }
 0x30b   : > { %v577_v63 = vrot.slane %v576_v62, 1 }
 0x30d   : > { %v578_v0 = vadd.f32 %v577_v63, %v576_v62 }
 0x30f   : > { %vm579_vm10 = vcmp.gt.f32.partialorder %v3225_v50, %v578_v0  ;;  %vm581_vm11 = vcmp.eq.f32.partialorder %v3225_v50, %v578_v0  ;;  %vm582_vm12 = vcmp.eq.f32.partialorder %v3223_v49, %v578_v0  ;;  %vm580_vm13 = vcmp.gt.f32.partialorder %v3223_v49, %v578_v0  ;;  %v841_v49 = vld [vmem:[%s3849_s3 + $0x28] sm:$0xff]  ;;  %v842_v50 = vld [vmem:[%s3849_s3 + $0x30] sm:$0xff] }
 0x310   : > { %vm585_vm14 = vmand %vm581_vm11, %vm583_vm8  ;;  %v3091_v51 = vpack.c.bf16 %v842_v50, %v841_v49  ;;  %v1370_v49 = vld [vmem:[%s3849_s3 + $0xd0] sm:$0xff]  ;;  %v1371_v50 = vld [vmem:[%s3849_s3 + $0xd8] sm:$0xff] }
 0x311   : > { %vm586_vm15 = vmand %vm582_vm12, %vm584_vm9 }
 0x312   : > { %vm587_vm6 = vmor %vm579_vm10, %vm585_vm14 }
 0x313   : > { %vm588_vm7 = vmor %vm580_vm13, %vm586_vm15  ;;  %v2618_v1 = vsel %vm587_vm6, 1.0, %v3253_v42  ;;  %vm1346_vm15 = vcmask 519168   ;;  %vm1374_vm6 = vcmask 27648  }
 0x314   : > { %v2619_v2 = vsel %vm588_vm7, 1.0, %v3253_v42  ;;  %v593_v3 = vsel %vm262_vm0, %v2618_v1, 0.0  ;;  %vm1457_vm7 = vcmask 1043456  }
 0x315   : > { %v594_v4 = vsel %vm262_vm0, %v2619_v2, 0.0  ;;  %v2628_v2 = vld [vmem:[%s3849_s3 + $0x98] ss:$0 sm:$0xff] }
 0x316   : > { %v595_v5 = vadd.f32 %v594_v4, %v593_v3 }
 0x318   : > { %v596_v6 = vrot.slane %v595_v5, 4 }
 0x31a   : > { %v597_v7 = vadd.f32 %v596_v6, %v595_v5 }
 0x31c   : > { %v598_v8 = vrot.slane %v597_v7, 2 }
 0x31e   : > { %v599_v9 = vadd.f32 %v598_v8, %v597_v7 }
 0x320   : > { %v600_v10 = vrot.slane %v599_v9, 1 }
 0x322   : > { %v601_v11 = vadd.f32 %v600_v10, %v599_v9 }
 0x324   : > { %v3197_v12 = vtrunc.f32 %v601_v11 }
 0x326   : > { %v3198_v13 = vcvt.f32.s32 %v3197_v12 }
 0x328   : > { %vm603_vm9 = vcmp.eq.s32.totalorder %v3332_v24, %v3198_v13 }
 0x329   : > { %v2620_v14 = vsel %vm603_vm9, 1.0, %v3253_v42  ;;  %vm1453_vm9 = vcmask 31744  }
 0x32a   : > { %2812 = vmatmul.mubr.msk.f32.vlgmr.msra.gmra.mrb[2].mxu0 %vm262_vm0, %v2620_v14  ;;  %2819 = vmatmul.mubr.msk.f32.vlgmr.msra.gmra.mrb[2].mxu1 %vm262_vm0, %v2620_v14 }
 0x32b   : > { %2822 = vmatpush3.xpose.msk.msra.mxu0 %vm262_vm0, %v2620_v14  ;;  %2823 = vmatprep.mubr.msk.f32.mxu0 %vm3254_vm5, %v3253_v42 }
 0x32c   : > { %3075 = vmatprep.subr.bf16.mxu0 %v3252_v41  ;;  %2828 = vmatprep.mubr.msk.f32.mxu1 %vm3254_vm5, %v3253_v42 }
 0x397   : > { %v1092_v63 = vpop.xlane.xlu0 %1091 }
 0x3fd   : > { %v3398_v20 = vpop.f32.mrb[2].mxu0  ;;  %v747_v21 = vpop.f32.mrb[2].mxu1 }
 0x3fe   : > { %v2813_v22 = vpop.f32.mrb[3].mxu0  ;;  %v2820_v23 = vpop.f32.mrb[3].mxu1  ;;  %2824 = vmatmul.mubr.msk.f32.vlgmr.msra.gmra.mrb[4].mxu0 %vm262_vm0, %v747_v21  ;;  %2827 = vmatpush3.msra.mxu1 %v3398_v20  ;;  %vm856_vm0 = vcmask 64512   ;;  %v831_v52 = vsel %vm548_vm4, %v3398_v20, 0.0  ;;  %v824_v53 = vsel %vm548_vm4, %v3398_v20, -inf }
 0x3ff   : > { %3077 = vmatpush3.bf16.msra.mxu0 %v3076_v17  ;;  %2847 = vmatprep.mubr.msk.f32.mxu0 %vm3254_vm5, %v3253_v42  ;;  %v825_v55 = vrot.slane %v824_v53, 4 }
 0x400   : > { %3078 = vmatprep.subr.bf16.mxu0 %v3252_v41  ;;  %3087 = vmatprep.subr.bf16.mxu1 %v3252_v41 }
 0x403   : > { %3080 = vmatpush3.bf16.msra.mxu0 %v3079_v25 }
 0x404   : > { %3081 = vmatprep.subr.bf16.mxu0 %v3252_v41 }
 0x407   : > { %3083 = vmatpush3.bf16.msra.mxu0 %v3082_v29 }
 0x408   : > { %3084 = vmatprep.subr.bf16.mxu0 %v3252_v41 }
 0x40b   : > { %3086 = vmatpush3.bf16.msra.mxu0 %v3085_v32 }
 0x40c   : > { %2869 = vmatprep.subr.mxu0 %v3253_v42 }
 0x40e   : > { %2848 = vmatmul.mubr.msk.f32.vlgmr.msra.gmra.mrb[6].mxu0 %vm548_vm4, %v3398_v20 }
 0x40f   : > { %2871 = vmatprep.mubr.msk.f32.mxu0 %vm3254_vm5, %v3253_v42 }
 0x4d1   : > { %v820_v33 = vpop.f32.mrb[4].mxu0 }
 0x4d2   : > { %v2825_v34 = vpop.f32.mrb[5].mxu0  ;;  %v857_v35 = vsel %vm856_vm0, %v820_v33, 0.0 }
 0x4d3   : > { %858 = vadd.xlane.f32.xlu1 %v857_v35  ;;  %v1364_v34 = vld [vmem:[%s3849_s3 + $0xa0] sm:$0xff]  ;;  %v1365_v35 = vld [vmem:[%s3849_s3 + $0xa8] sm:$0xff] }
 0x4e1   : > { %v1005_v36 = vpop.f32.mrb[6].mxu0 }
 0x4e2   : > { %v2849_v37 = vpop.f32.mrb[7].mxu0 }
 0x4e3   : > { %v3100_v37 = vpack.c.bf16 %v1365_v35, %v1364_v34 }
 0x560   : > { %v859_v38 = vpop.xlane.xlu1 %858 }
 0x561   : > { %v860_v39 = vmax.f32 %v859_v38, 1.0  ;;  %v1366_v38 = vld [vmem:[%s3849_s3 + $0xb0] sm:$0xff] }
 0x563   : > { %3226 = vrcp.f32 %v860_v39  ;;  %v1367_v39 = vld [vmem:[%s3849_s3 + $0xb8] sm:$0xff] }
 0x564   : > { %3228 = vrsqrt.f32 %v1092_v63  ;;  %v3103_v43 = vpack.c.bf16 %v1367_v39, %v1366_v38 }
 0x56d   : > { %v3227_v44 = vpop.eup %3226 }
 0x56e   : > { %v862_v47 = vmul.f32 %v3227_v44, %v820_v33  ;;  %v3229_v0 = vpop.eup %3228  ;;  %v1368_v44 = vld [vmem:[%s3849_s3 + $0xc0] sm:$0xff] }
 0x56f   : > { %v1094_v1 = vmul.f32 %v3229_v0, %v1088_v58 }
 0x570   : > { %2829 = vmatmul.mubr.msk.f32.vlgmr.msra.gmra.mrb[4].mxu1 %vm856_vm0, %v862_v47 }
 0x571   : > { %3089 = vmatpush3.bf16.msra.mxu1 %v3088_v45  ;;  %2866 = vmatprep.mubr.msk.f32.mxu1 %vm3254_vm5, %v3253_v42  ;;  %v1098_v7 = vrot.slane %v1094_v1, %v3335_v27  ;;  %v1369_v45 = vld [vmem:[%s3849_s3 + $0xc8] sm:$0xff] }
 0x572   : > { %3090 = vmatprep.subr.bf16.mxu1 %v3252_v41  ;;  %v3106_v47 = vpack.c.bf16 %v1369_v45, %v1368_v44 }
 0x575   : > { %3092 = vmatpush3.bf16.msra.mxu1 %v3091_v51  ;;  %v3109_v51 = vpack.c.bf16 %v1371_v50, %v1370_v49 }
 0x576   : > { %3093 = vmatprep.subr.bf16.mxu1 %v3252_v41 }
 0x579   : > { %3095 = vmatpush3.bf16.msra.mxu1 %v3094_v54  ;;  %v832_v54 = vrot.slane %v831_v52, 4 }
 0x57a   : > { %3096 = vmatprep.subr.bf16.mxu1 %v3252_v41 }
 0x57b   : > { %v833_v56 = vadd.f32 %v832_v54, %v831_v52  ;;  %v1747_v54 = vld [vmem:[%s3849_s3 + $0xe8] sm:$0xff] }
 0x57d   : > { %3098 = vmatpush3.bf16.msra.mxu1 %v3097_v57  ;;  %v826_v57 = vmax.f32 %v824_v53, %v825_v55  ;;  %v834_v58 = vrot.slane %v833_v56, 2  ;;  %v1748_v55 = vld [vmem:[%s3849_s3 + $0xf0] sm:$0xff] }
 0x57e   : > { %2874 = vmatprep.subr.mxu1 %v3253_v42 }
 0x57f   : > { %v827_v59 = vrot.slane %v826_v57, 2  ;;  %v835_v20 = vadd.f32 %v834_v58, %v833_v56  ;;  %v1749_v56 = vld [vmem:[%s3849_s3 + $0xf8] sm:$0xff]  ;;  %v1750_v58 = vld [vmem:[%s3849_s3 + $0x100] sm:$0xff] }
 0x643   : > { %v932_v61 = vpop.f32.mrb[4].mxu1 }
 0x644   : > { %v2830_v62 = vpop.f32.mrb[5].mxu1  ;;  %2867 = vmatmul.mubr.msk.f32.vlgmr.msra.gmra.mrb[6].mxu1 %vm548_vm4, %v932_v61 }
 0x645   : > { %2875 = vmatpush3.msra.mxu1 %v820_v33  ;;  %2876 = vmatprep.mubr.msk.f32.mxu1 %vm3254_vm5, %v3253_v42 }
 0x646   : > { %3099 = vmatprep.subr.bf16.mxu1 %v3252_v41 }
 0x717   : > { %v1078_v3 = vpop.f32.mrb[6].mxu1 }
 0x718   : > { %v1079_v4 = vadd.f32 %v1078_v3, %v1005_v36  ;;  %v2868_v5 = vpop.f32.mrb[7].mxu1 }
 0x71a   : > { %v1086_v6 = vadd.f32 %v2628_v2, %v1079_v4  ;;  %v828_v4 = vmax.f32 %v826_v57, %v827_v59  ;;  %v3112_v57 = vpack.c.bf16 %v1748_v55, %v1747_v54  ;;  %v3115_v59 = vpack.c.bf16 %v1750_v58, %v1749_v56 }
 0x71c   : > { %v1087_v8 = vmax.f32 %v1086_v6, 0.0 }
 0x71e   : > { %v1099_v9 = vmul.f32 %v1098_v7, %v1087_v8 }
 0x720   : > { %v1100_v10 = vsel %vm548_vm4, %v1099_v9, 0.0  ;;  %v836_v9 = vrot.slane %v835_v20, 1 }
 0x721   : > { %1101 = vadd.xlane.f32.xlu1 %v1100_v10 }
 0x7ae   : > { %v1102_v11 = vpop.xlane.xlu1 %1101 }
 0x7af   : > { %3230 = vtanh.f32 %v1102_v11 }
 0x7b9   : > { %v3231_v12 = vpop.eup %3230 }
 0x7ba   : > { %v1129_v13 = vmul.f32 %v3231_v12, %v1087_v8  ;;  %v1104_v14 = vmul.f32 %v3231_v12, %v3360_v48 }
 0x7bc   : > { %2870 = vmatpush3.msra.mxu0 %v1129_v13  ;;  %v1105_v15 = vsel %vm856_vm0, %v1104_v14, 0.0  ;;  %v837_v14 = vadd.f32 %v836_v9, %v835_v20 }
 0x7bd   : > { %2879 = vmatprep.subr.mxu0 %v3253_v42  ;;  %v1106_v16 = vrot.slane %v1105_v15, 4 }
 0x7bf   : > { %v1107_v17 = vadd.f32 %v1106_v16, %v1105_v15 }
 0x7c1   : > { %v1108_v18 = vrot.slane %v1107_v17, 2 }
 0x7c3   : > { %v1109_v19 = vadd.f32 %v1108_v18, %v1107_v17 }
 0x7c5   : > { %v1110_v21 = vrot.slane %v1109_v19, 1 }
 0x7c7   : > { %v1111_v22 = vadd.f32 %v1110_v21, %v1109_v19  ;;  %v838_v19 = vmul.f32 0.125, %v837_v14 }
 0x7c9   : > { %vm1112_vm10 = vcmp.gt.f32.partialorder %v3231_v12, %v1111_v22  ;;  %vm1113_vm11 = vcmp.eq.f32.partialorder %v3231_v12, %v1111_v22  ;;  %v829_v12 = vrot.slane %v828_v4, 1 }
 0x7ca   : > { %vm1114_vm12 = vmand %vm1113_vm11, %vm583_vm8 }
 0x7cb   : > { %vm1115_vm13 = vmor %vm1112_vm10, %vm1114_vm12  ;;  %v830_v16 = vmax.f32 %v828_v4, %v829_v12 }
 0x7cc   : > { %v2629_v23 = vsel %vm1115_vm13, 1.0, %v3253_v42 }
 0x7cd   : > { %v1118_v25 = vsel %vm856_vm0, %v2629_v23, 0.0 }
 0x7ce   : > { %v1119_v26 = vrot.slane %v1118_v25, 4 }
 0x7d0   : > { %v1120_v28 = vadd.f32 %v1119_v26, %v1118_v25 }
 0x7d2   : > { %v1121_v29 = vrot.slane %v1120_v28, 2 }
 0x7d4   : > { %v1122_v30 = vadd.f32 %v1121_v29, %v1120_v28 }
 0x7d6   : > { %v1123_v31 = vrot.slane %v1122_v30, 1 }
 0x7d8   : > { %v1124_v32 = vadd.f32 %v1123_v31, %v1122_v30 }
 0x7da   : > { %v3199_v33 = vtrunc.f32 %v1124_v32  ;;  %v1538_v32 = vld [vmem:[%s3849_s3 + $0x140] sm:$0x1] }
 0x7dc   : > { %v3200_v36 = vcvt.f32.s32 %v3199_v33  ;;  %v1539_v33 = vmul.f32 %v1538_v32, %v1538_v32 }
 0x7de   : > { %vm1126_vm14 = vcmp.eq.s32.totalorder %v3332_v24, %v3200_v36  ;;  %v1540_v34 = vsel %vm536_vm3, %v1539_v33, 0.0 }
 0x7df   : > { %v2630_v40 = vsel %vm1126_vm14, 1.0, %v3253_v42  ;;  %1541 = vadd.xlane.f32.xlu1 %v1540_v34 }
 0x7e0   : > { %2872 = vmatmul.mubr.msk.f32.vlgmr.msra.gmra.mrb[8].mxu0 %vm856_vm0, %v2630_v40  ;;  %2877 = vmatmul.mubr.msk.f32.vlgmr.msra.gmra.mrb[8].mxu1 %vm856_vm0, %v2630_v40 }
 0x7e1   : > { %2880 = vmatpush3.xpose.msk.msra.mxu0 %vm856_vm0, %v2630_v40  ;;  %3101 = vmatpush3.bf16.msra.mxu1 %v3100_v37 }
 0x7e2   : > { %3102 = vmatprep.subr.bf16.mxu1 %v3252_v41  ;;  %2881 = vmatprep.mubr.msk.f32.mxu0 %vm3254_vm5, %v3253_v42 }
 0x7e3   : > { %2900 = vmatprep.mubr.msk.f32.mxu1 %vm3254_vm5, %v3253_v42  ;;  %2903 = vmatprep.subr.mxu0 %v3253_v42 }
 0x7e5   : > { %3104 = vmatpush3.bf16.msra.mxu1 %v3103_v43  ;;  %v2638_v43 = vld [vmem:[%s3849_s3 + $0xe0] ss:$0 sm:$0xff] }
 0x7e6   : > { %3105 = vmatprep.subr.bf16.mxu1 %v3252_v41 }
 0x7e9   : > { %3107 = vmatpush3.bf16.msra.mxu1 %v3106_v47 }
 0x7ea   : > { %3108 = vmatprep.subr.bf16.mxu1 %v3252_v41 }
 0x7ed   : > { %3110 = vmatpush3.bf16.msra.mxu1 %v3109_v51 }
 0x7ee   : > { %3111 = vmatprep.subr.bf16.mxu1 %v3252_v41 }
 0x86c   : > { %v1542_v38 = vpop.xlane.xlu1 %1541 }
 0x8b3   : > { %v1199_v60 = vpop.f32.mrb[8].mxu0  ;;  %v1269_v61 = vpop.f32.mrb[8].mxu1 }
 0x8b4   : > { %v2873_v62 = vpop.f32.mrb[9].mxu0  ;;  %v2878_v63 = vpop.f32.mrb[9].mxu1  ;;  %2882 = vmatmul.mubr.msk.f32.vlgmr.msra.gmra.mrb[10].mxu0 %vm856_vm0, %v1269_v61  ;;  %2901 = vmatmul.mubr.msk.f32.vlgmr.msra.gmra.mrb[10].mxu1 %vm548_vm4, %v1199_v60  ;;  %v1347_v0 = vsel %vm1346_vm15, %v1199_v60, -inf  ;;  %v1354_v1 = vsel %vm1346_vm15, %v1199_v60, 0.0  ;;  %v1751_v60 = vld [vmem:[%s3849_s3 + $0x108] sm:$0xff]  ;;  %v1752_v61 = vld [vmem:[%s3849_s3 + $0x110] sm:$0xff] }
 0x8b5   : > { %2905 = vmatprep.mubr.msk.f32.mxu0 %vm3254_vm5, %v3253_v42  ;;  %v1348_v2 = vrot.slane %v1347_v0, 4  ;;  %v1355_v3 = vrot.slane %v1354_v1, 4  ;;  %2939 = vmatprep.mubr.msk.f32.mxu1 %vm3254_vm5, %v3253_v42  ;;  %v3118_v62 = vpack.c.bf16 %v1752_v61, %v1751_v60  ;;  %v1753_v63 = vld [vmem:[%s3849_s3 + $0x118] sm:$0xff] }
 0x8b6   : > { %3113 = vmatpush3.bf16.msra.mxu1 %v3112_v57 }
 0x8b7   : > { %v1349_v5 = vmax.f32 %v1347_v0, %v1348_v2  ;;  %v1356_v6 = vadd.f32 %v1355_v3, %v1354_v1  ;;  %3114 = vmatprep.subr.bf16.mxu1 %v3252_v41  ;;  %v1754_v0 = vld [vmem:[%s3849_s3 + $0x120] sm:$0xff] }
 0x8b8   : > { %v3121_v1 = vpack.c.bf16 %v1754_v0, %v1753_v63 }
 0x8b9   : > { %v1350_v7 = vrot.slane %v1349_v5, 2  ;;  %v1357_v8 = vrot.slane %v1356_v6, 2 }
 0x8ba   : > { %3116 = vmatpush3.bf16.msra.mxu1 %v3115_v59  ;;  %v1991_v59 = vld [vmem:[%s3849_s3 + $0x148] sm:$0x1] }
 0x8bb   : > { %v1351_v10 = vmax.f32 %v1349_v5, %v1350_v7  ;;  %v1358_v11 = vadd.f32 %v1357_v8, %v1356_v6  ;;  %3117 = vmatprep.subr.bf16.mxu1 %v3252_v41  ;;  %v1992_v60 = vmul.f32 %v1991_v59, %v1991_v59 }
 0x8bd   : > { %v1359_v13 = vrot.slane %v1358_v11, 1  ;;  %v1352_v15 = vrot.slane %v1351_v10, 1 }
 0x8be   : > { %3119 = vmatpush3.bf16.msra.mxu1 %v3118_v62 }
 0x8bf   : > { %v1353_v17 = vmax.f32 %v1351_v10, %v1352_v15  ;;  %v1360_v18 = vadd.f32 %v1359_v13, %v1358_v11  ;;  %3120 = vmatprep.subr.bf16.mxu1 %v3252_v41 }
 0x8c1   : > { %v1361_v21 = vmul.f32 0.25, %v1360_v18  ;;  %v3528_v22 = vadd.f32 %v1353_v17, %v830_v16 }
 0x8c2   : > { %3122 = vmatpush3.bf16.msra.mxu1 %v3121_v1 }
 0x8c3   : > { %v3530_v23 = vadd.f32 %v1361_v21, %v838_v19  ;;  %3135 = vmatprep.subr.bf16.mxu1 %v3252_v41 }
 0x987   : > { %v3532_v25 = vpop.f32.mrb[10].mxu0  ;;  %v1448_v26 = vpop.f32.mrb[10].mxu1 }
 0x988   : > { %v1373_v28 = vadd.f32 %v3360_v48, %v3532_v25  ;;  %v2883_v29 = vpop.f32.mrb[11].mxu0  ;;  %v2902_v30 = vpop.f32.mrb[11].mxu1 }
 0x98a   : > { %v1375_v31 = vsel %vm1374_vm6, %v1373_v28, 0.0 }
 0x98b   : > { %1376 = vadd.xlane.f32.xlu0 %v1375_v31 }
 0xa18   : > { %v1377_v35 = vpop.xlane.xlu0 %1376 }
 0xa19   : > { %3232 = vrsqrt.f32 %v1377_v35 }
 0xa1a   : > { %3234 = vrsqrt.f32 %v1542_v38 }
 0xa23   : > { %v3233_v36 = vpop.eup %3232 }
 0xa24   : > { %v1452_v37 = vmul.f32 %v3233_v36, %v1448_v26  ;;  %v3235_v39 = vpop.eup %3234 }
 0xa25   : > { %v1544_v40 = vmul.f32 %v3235_v39, %v1538_v32 }
 0xa26   : > { %2904 = vmatpush3.msk.msra.mxu0 %vm1457_vm7, %v1452_v37 }
 0xa27   : > { %2906 = vmatmul.mubr.msk.f32.vlgmr.msra.gmra.mrb[12].mxu0 %vm1453_vm9, %v1373_v28  ;;  %2908 = vmatprep.subr.mxu0 %v3253_v42  ;;  %v1548_v50 = vrot.slane %v1544_v40, %v3335_v27 }
 0xa28   : > { %2910 = vmatprep.mubr.msk.f32.mxu0 %vm3254_vm5, %v3253_v42 }
 0xafa   : > { %v1527_v44 = vpop.f32.mrb[12].mxu0 }
 0xafb   : > { %v1531_v45 = vmul.f32 %v3233_v36, %v1527_v44  ;;  %v2907_v47 = vpop.f32.mrb[13].mxu0 }
 0xafd   : > { %v1536_v49 = vadd.f32 %v2638_v43, %v1531_v45 }
 0xaff   : > { %v1537_v51 = vmax.f32 %v1536_v49, 0.0 }
 0xb01   : > { %v1549_v52 = vmul.f32 %v1548_v50, %v1537_v51 }
 0xb03   : > { %v1550_v53 = vsel %vm1346_vm15, %v1549_v52, 0.0  ;;  %vm1729_vm15 = vcmask 517120  }
 0xb04   : > { %1551 = vadd.xlane.f32.xlu0 %v1550_v53 }
 0xb91   : > { %v1552_v20 = vpop.xlane.xlu0 %1551 }
 0xb92   : > { %3236 = vtanh.f32 %v1552_v20  ;;  %v2650_v20 = vld [vmem:[%s3849_s3 + $0x128] ss:$0 sm:$0xff] }
 0xb9c   : > { %v3237_v2 = vpop.eup %3236 }
 0xb9d   : > { %v1579_v3 = vmul.f32 %v3237_v2, %v1537_v51  ;;  %v1554_v4 = vmul.f32 %v3237_v2, %v3360_v48 }
 0xb9f   : > { %2909 = vmatpush3.msk.msra.mxu0 %vm1457_vm7, %v1579_v3  ;;  %v1555_v5 = vsel %vm1374_vm6, %v1554_v4, 0.0 }
 0xba0   : > { %2913 = vmatprep.subr.mxu0 %v3253_v42  ;;  %v1556_v6 = vrot.slane %v1555_v5, 4 }
 0xba2   : > { %v1557_v7 = vadd.f32 %v1556_v6, %v1555_v5 }
 0xba4   : > { %v1558_v8 = vrot.slane %v1557_v7, 2 }
 0xba6   : > { %v1559_v9 = vadd.f32 %v1558_v8, %v1557_v7 }
 0xba8   : > { %v1560_v10 = vrot.slane %v1559_v9, 1 }
 0xbaa   : > { %v1561_v11 = vadd.f32 %v1560_v10, %v1559_v9  ;;  %v2112_v10 = vld [vmem:[%s3850_s4] sm:$0xff] }
 0xbac   : > { %vm1562_vm10 = vcmp.gt.f32.partialorder %v3237_v2, %v1561_v11  ;;  %vm1563_vm11 = vcmp.eq.f32.partialorder %v3237_v2, %v1561_v11  ;;  %v2113_v11 = vld [vmem:[%s3850_s4 + $0x8] sm:$0xff] }
 0xbad   : > { %vm1564_vm12 = vmand %vm1563_vm11, %vm583_vm8 }
 0xbae   : > { %vm1565_vm13 = vmor %vm1562_vm10, %vm1564_vm12 }
 0xbaf   : > { %v2639_v12 = vsel %vm1565_vm13, 1.0, %v3253_v42 }
 0xbb0   : > { %v1568_v13 = vsel %vm1374_vm6, %v2639_v12, 0.0  ;;  %vm1829_vm6 = vcmask 9216   ;;  %v3136_v12 = vpack.c.bf16 %v2113_v11, %v2112_v10  ;;  %v2361_v11 = vld [vmem:[%s3850_s4 + $0xd0] sm:$0xff] }
 0xbb1   : > { %v1569_v14 = vrot.slane %v1568_v13, 4 }
 0xbb3   : > { %v1570_v15 = vadd.f32 %v1569_v14, %v1568_v13  ;;  %v2115_v13 = vld [vmem:[%s3850_s4 + $0x18] sm:$0xff] }
 0xbb5   : > { %v1571_v16 = vrot.slane %v1570_v15, 2 }
 0xbb7   : > { %v1572_v17 = vadd.f32 %v1571_v16, %v1570_v15  ;;  %v2116_v15 = vld [vmem:[%s3850_s4 + $0x20] sm:$0xff]  ;;  %v2117_v16 = vld [vmem:[%s3850_s4 + $0x28] sm:$0xff] }
 0xbb9   : > { %v1573_v18 = vrot.slane %v1572_v17, 1 }
 0xbbb   : > { %v1574_v19 = vadd.f32 %v1573_v18, %v1572_v17  ;;  %v3142_v17 = vpack.c.bf16 %v2117_v16, %v2116_v15  ;;  %v2365_v16 = vld [vmem:[%s3850_s4 + $0xf0] sm:$0xff] }
 0xbbd   : > { %v3201_v21 = vtrunc.f32 %v1574_v19 }
 0xbbf   : > { %v3202_v26 = vcvt.f32.s32 %v3201_v21 }
 0xbc1   : > { %vm1576_vm14 = vcmp.eq.s32.totalorder %v3332_v24, %v3202_v26 }
 0xbc2   : > { %v2640_v28 = vsel %vm1576_vm14, 1.0, %v3253_v42 }
 0xbc3   : > { %2911 = vmatmul.mubr.msk.f32.vlgmr.msra.gmra.mrb[14].mxu0 %vm1453_vm9, %v2640_v28 }
 0xbc4   : > { %2914 = vmatpush3.msk.msra.mxu0 %vm1457_vm7, %v3532_v25  ;;  %2915 = vmatprep.mubr.msk.f32.mxu0 %vm3254_vm5, %v3253_v42 }
 0xbc5   : > { %2918 = vmatprep.subr.mxu0 %v3253_v42 }
 0xbc7   : > { %2916 = vmatmul.mubr.msk.f32.vlgmr.msra.gmra.mrb[16].mxu0 %vm1453_vm9, %v2640_v28 }
 0xbc8   : > { %2920 = vmatprep.mubr.msk.f32.mxu0 %vm3254_vm5, %v3253_v42 }
 0xbcb   : > { %2919 = vmatpush3.xpose.msk.msra.mxu0 %vm1453_vm9, %v2640_v28 }
 0xbcc   : > { %2942 = vmatprep.subr.mxu0 %v3253_v42 }
 0xc96   : > { %v1652_v29 = vpop.f32.mrb[14].mxu0 }
 0xc97   : > { %v2912_v30 = vpop.f32.mrb[15].mxu0  ;;  %2940 = vmatmul.mubr.msk.f32.vlgmr.msra.gmra.mrb[12].mxu1 %vm548_vm4, %v1652_v29  ;;  %v1730_v25 = vsel %vm1729_vm15, %v1652_v29, -inf  ;;  %v1737_v31 = vsel %vm1729_vm15, %v1652_v29, 0.0 }
 0xc98   : > { %v1731_v32 = vrot.slane %v1730_v25, 4  ;;  %v1738_v33 = vrot.slane %v1737_v31, 4  ;;  %2987 = vmatprep.mubr.msk.f32.mxu1 %vm3254_vm5, %v3253_v42  ;;  %3137 = vmatpush3.bf16.msra.mxu1 %v3136_v12  ;;  %v2362_v12 = vld [vmem:[%s3850_s4 + $0xd8] sm:$0xff] }
 0xc99   : > { %3138 = vmatprep.subr.bf16.mxu1 %v3252_v41 }
 0xc9a   : > { %v1725_v34 = vpop.f32.mrb[16].mxu0  ;;  %v1732_v35 = vmax.f32 %v1730_v25, %v1731_v32  ;;  %v1739_v36 = vadd.f32 %v1738_v33, %v1737_v31 }
 0xc9b   : > { %v2917_v37 = vpop.f32.mrb[17].mxu0  ;;  %2921 = vmatmul.mubr.msk.f32.vlgmr.msra.gmra.mrb[18].mxu0 %vm1453_vm9, %v1725_v34 }
 0xc9c   : > { %2944 = vmatprep.mubr.msk.f32.mxu0 %vm3254_vm5, %v3253_v42  ;;  %v1733_v38 = vrot.slane %v1732_v35, 2  ;;  %v1740_v39 = vrot.slane %v1739_v36, 2 }
 0xc9e   : > { %v1741_v40 = vadd.f32 %v1740_v39, %v1739_v36  ;;  %v1734_v43 = vmax.f32 %v1732_v35, %v1733_v38 }
 0xca0   : > { %v1735_v44 = vrot.slane %v1734_v43, 1  ;;  %v1742_v45 = vrot.slane %v1741_v40, 1 }
 0xca2   : > { %v1736_v47 = vmax.f32 %v1734_v43, %v1735_v44  ;;  %v1743_v49 = vadd.f32 %v1742_v45, %v1741_v40  ;;  %v2120_v44 = vld [vmem:[%s3850_s4 + $0x40] sm:$0xff] }
 0xca4   : > { %v1744_v50 = vmul.f32 0.5, %v1743_v49  ;;  %v3610_v51 = vadd.f32 %v1736_v47, %v3528_v22  ;;  %v1993_v22 = vsel %vm536_vm3, %v1992_v60, 0.0  ;;  %v3124_v47 = vpack.c.bf16 %v2121_v46, %v2120_v44  ;;  %v2122_v49 = vld [vmem:[%s3850_s4 + $0x50] sm:$0xff] }
 0xca5   : > { %1994 = vadd.xlane.f32.xlu0 %v1993_v22  ;;  %v2119_v22 = vld [vmem:[%s3850_s4 + $0x38] sm:$0xff]  ;;  %v2452_v44 = vld [vmem:[%s3850_s4 + $0x170] sm:$0xff] }
 0xca6   : > { %v3613_v52 = vadd.f32 %v1744_v50, %v3530_v23  ;;  %v2123_v50 = vld [vmem:[%s3850_s4 + $0x58] sm:$0xff] }
 0xd32   : > { %v1995_v63 = vpop.xlane.xlu0 %1994 }
 0xd6a   : > { %v1903_v53 = vpop.f32.mrb[12].mxu1 }
 0xd6b   : > { %v2941_v54 = vpop.f32.mrb[13].mxu1 }
 0xd6c   : > { %v3127_v54 = vpack.c.bf16 %v2123_v50, %v2122_v49 }
 0xd6e   : > { %v1825_v55 = vpop.f32.mrb[18].mxu0 }
 0xd6f   : > { %v1826_v56 = vadd.f32 %v3360_v48, %v1825_v55  ;;  %v2922_v57 = vpop.f32.mrb[19].mxu0  ;;  %v2125_v55 = vld [vmem:[%s3850_s4 + $0x68] sm:$0xff] }
 0xd70   : > { %v2126_v57 = vld [vmem:[%s3850_s4 + $0x70] sm:$0xff] }
 0xd71   : > { %v1830_v58 = vsel %vm1829_vm6, %v1826_v56, 0.0 }
 0xd72   : > { %1831 = vadd.xlane.f32.xlu1 %v1830_v58  ;;  %v2127_v58 = vld [vmem:[%s3850_s4 + $0x78] sm:$0xff] }
 0xd73   : > { %v3133_v60 = vpack.c.bf16 %v2127_v58, %v2126_v57  ;;  %v2350_v57 = vld [vmem:[%s3850_s4 + $0x88] sm:$0x1] }
 0xdff   : > { %v1832_v23 = vpop.xlane.xlu1 %1831 }
 0xe00   : > { %3238 = vrsqrt.f32 %v1832_v23 }
 0xe01   : > { %3240 = vrsqrt.f32 %v1995_v63 }
 0xe0a   : > { %v3239_v61 = vpop.eup %3238 }
 0xe0b   : > { %v1907_v62 = vmul.f32 %v3239_v61, %v1903_v53  ;;  %v3241_v0 = vpop.eup %3240 }
 0xe0c   : > { %v1997_v1 = vmul.f32 %v3241_v0, %v1991_v59  ;;  %v2118_v59 = vld [vmem:[%s3850_s4 + $0x30] sm:$0xff] }
 0xe0d   : > { %2943 = vmatpush3.msk.msra.mxu0 %vm363_vm1, %v1907_v62  ;;  %v3145_v23 = vpack.c.bf16 %v2119_v22, %v2118_v59 }
 0xe0e   : > { %2945 = vmatmul.mubr.msk.f32.vlgmr.msra.gmra.mrb[20].mxu0 %vm356_vm2, %v1826_v56  ;;  %2947 = vmatprep.subr.mxu0 %v3253_v42  ;;  %v2001_v6 = vrot.slane %v1997_v1, %v3335_v27  ;;  %v2114_v27 = vld [vmem:[%s3850_s4 + $0x10] sm:$0xff]  ;;  %v2275_v1 = vld [vmem:[%s3850_s4 + $0x80] sm:$0xff] }
 0xe0f   : > { %2949 = vmatprep.mubr.msk.f32.mxu0 %vm3254_vm5, %v3253_v42  ;;  %v3139_v14 = vpack.c.bf16 %v2115_v13, %v2114_v27  ;;  %v3160_v27 = vpack.c.bf16 %v2362_v12, %v2361_v11  ;;  %v2363_v13 = vld [vmem:[%s3850_s4 + $0xe0] sm:$0xff] }
 0xe11   : > { %3140 = vmatpush3.bf16.msra.mxu1 %v3139_v14  ;;  %v2364_v14 = vld [vmem:[%s3850_s4 + $0xe8] sm:$0xff] }
 0xe12   : > { %3141 = vmatprep.subr.bf16.mxu1 %v3252_v41  ;;  %v3163_v15 = vpack.c.bf16 %v2364_v14, %v2363_v13 }
 0xe15   : > { %3143 = vmatpush3.bf16.msra.mxu1 %v3142_v17  ;;  %v2366_v17 = vld [vmem:[%s3850_s4 + $0xf8] sm:$0xff] }
 0xe16   : > { %3144 = vmatprep.subr.bf16.mxu1 %v3252_v41 }
 0xe19   : > { %3146 = vmatpush3.bf16.msra.mxu1 %v3145_v23  ;;  %v2456_v23 = vld [vmem:[%s3850_s4 + $0x190] sm:$0xff] }
 0xe1a   : > { %3171 = vmatprep.subr.bf16.mxu1 %v3252_v41 }
 0xee1   : > { %v1980_v2 = vpop.f32.mrb[20].mxu0 }
 0xee2   : > { %v1984_v3 = vmul.f32 %v3239_v61, %v1980_v2  ;;  %v2946_v4 = vpop.f32.mrb[21].mxu0  ;;  %v2354_v2 = vld [vmem:[%s3850_s4 + $0x98] sm:$0xff] }
 0xee3   : > { %v2356_v4 = vld [vmem:[%s3850_s4 + $0xa8] sm:$0xff] }
 0xee4   : > { %v1989_v5 = vadd.f32 %v2650_v20, %v1984_v3  ;;  %v2353_v20 = vld [vmem:[%s3850_s4 + $0x90] sm:$0xff]  ;;  %v2355_v3 = vld [vmem:[%s3850_s4 + $0xa0] sm:$0xff] }
 0xee6   : > { %v1990_v7 = vmax.f32 %v1989_v5, 0.0  ;;  %v3151_v5 = vpack.c.bf16 %v2356_v4, %v2355_v3 }
 0xee8   : > { %v2002_v8 = vmul.f32 %v2001_v6, %v1990_v7  ;;  %v2357_v6 = vld [vmem:[%s3850_s4 + $0xb0] sm:$0xff] }
 0xeea   : > { %v2003_v9 = vsel %vm1729_vm15, %v2002_v8, 0.0 }
 0xeeb   : > { %2004 = vadd.xlane.f32.xlu1 %v2003_v9  ;;  %v2359_v9 = vld [vmem:[%s3850_s4 + $0xc0] sm:$0xff] }
 0xf78   : > { %v2005_v18 = vpop.xlane.xlu1 %2004 }
 0xf79   : > { %3242 = vtanh.f32 %v2005_v18  ;;  %v3166_v18 = vpack.c.bf16 %v2366_v17, %v2365_v16 }
 0xf83   : > { %v3243_v19 = vpop.eup %3242 }
 0xf84   : > { %v2032_v21 = vmul.f32 %v3243_v19, %v1990_v7  ;;  %v2007_v26 = vmul.f32 %v3243_v19, %v3360_v48  ;;  %v2358_v7 = vld [vmem:[%s3850_s4 + $0xb8] sm:$0xff] }
 0xf85   : > { %v3154_v8 = vpack.c.bf16 %v2358_v7, %v2357_v6 }
 0xf86   : > { %2948 = vmatpush3.msk.msra.mxu0 %vm363_vm1, %v2032_v21  ;;  %v2008_v28 = vsel %vm1829_vm6, %v2007_v26, 0.0  ;;  %v2368_v21 = vld [vmem:[%s3850_s4 + $0x108] sm:$0xff] }
 0xf87   : > { %v2009_v29 = vrot.slane %v2008_v28, 4  ;;  %3123 = vmatprep.subr.bf16.mxu0 %v3252_v41 }
 0xf89   : > { %v2010_v30 = vadd.f32 %v2009_v29, %v2008_v28  ;;  %v2441_v28 = vld [vmem:[%s3850_s4 + $0x118] sm:$0xff]  ;;  %v2442_v29 = vld [vmem:[%s3850_s4 + $0x120] sm:$0xff] }
 0xf8b   : > { %v2011_v25 = vrot.slane %v2010_v30, 2 }
 0xf8d   : > { %v2012_v31 = vadd.f32 %v2011_v25, %v2010_v30  ;;  %v2443_v30 = vld [vmem:[%s3850_s4 + $0x128] sm:$0xff]  ;;  %v3172_v25 = vpack.c.bf16 %v2442_v29, %v2441_v28 }
 0xf8f   : > { %v2013_v32 = vrot.slane %v2012_v31, 1 }
 0xf91   : > { %v2014_v33 = vadd.f32 %v2013_v32, %v2012_v31  ;;  %v2444_v31 = vld [vmem:[%s3850_s4 + $0x130] sm:$0xff] }
 0xf92   : > { %v3175_v32 = vpack.c.bf16 %v2444_v31, %v2443_v30 }
 0xf93   : > { %vm2015_vm3 = vcmp.gt.f32.partialorder %v3243_v19, %v2014_v33  ;;  %vm2016_vm7 = vcmp.eq.f32.partialorder %v3243_v19, %v2014_v33  ;;  %v2367_v19 = vld [vmem:[%s3850_s4 + $0x100] sm:$0xff]  ;;  %v2445_v33 = vld [vmem:[%s3850_s4 + $0x138] sm:$0xff] }
 0xf94   : > { %vm2017_vm9 = vmand %vm2016_vm7, %vm583_vm8  ;;  %v3169_v26 = vpack.c.bf16 %v2368_v21, %v2367_v19 }
 0xf95   : > { %vm2018_vm10 = vmor %vm2015_vm3, %vm2017_vm9 }
 0xf96   : > { %v2651_v48 = vsel %vm2018_vm10, 1.0, %v3253_v42 }
 0xf97   : > { %v2021_v34 = vsel %vm1829_vm6, %v2651_v48, 0.0  ;;  %v2446_v48 = vld [vmem:[%s3850_s4 + $0x140] sm:$0xff] }
 0xf98   : > { %v2022_v35 = vrot.slane %v2021_v34, 4 }
 0xf9a   : > { %v2023_v36 = vadd.f32 %v2022_v35, %v2021_v34  ;;  %v3178_v34 = vpack.c.bf16 %v2446_v48, %v2445_v33  ;;  %v2447_v35 = vld [vmem:[%s3850_s4 + $0x148] sm:$0xff] }
 0xf9c   : > { %v2024_v37 = vrot.slane %v2023_v36, 2 }
 0xf9e   : > { %v2025_v38 = vadd.f32 %v2024_v37, %v2023_v36  ;;  %v2448_v36 = vld [vmem:[%s3850_s4 + $0x150] sm:$0xff] }
 0xf9f   : > { %v3181_v37 = vpack.c.bf16 %v2448_v36, %v2447_v35 }
 0xfa0   : > { %v2026_v39 = vrot.slane %v2025_v38, 1 }
 0xfa2   : > { %v2027_v40 = vadd.f32 %v2026_v39, %v2025_v38  ;;  %v2449_v38 = vld [vmem:[%s3850_s4 + $0x158] sm:$0xff]  ;;  %v2450_v39 = vld [vmem:[%s3850_s4 + $0x160] sm:$0xff] }
 0xfa4   : > { %v3203_v43 = vtrunc.f32 %v2027_v40  ;;  %v3184_v40 = vpack.c.bf16 %v2450_v39, %v2449_v38 }
 0xfa6   : > { %v3204_v45 = vcvt.f32.s32 %v3203_v43  ;;  %v2451_v43 = vld [vmem:[%s3850_s4 + $0x168] sm:$0xff] }
 0xfa7   : > { %v3187_v46 = vpack.c.bf16 %v2452_v44, %v2451_v43 }
 0xfa8   : > { %vm2029_vm1 = vcmp.eq.s32.totalorder %v3332_v24, %v3204_v45  ;;  %v2124_v24 = vld [vmem:[%s3850_s4 + $0x60] sm:$0xff]  ;;  %v2453_v45 = vld [vmem:[%s3850_s4 + $0x178] sm:$0xff] }
 0xfa9   : > { %v2652_v53 = vsel %vm2029_vm1, 1.0, %v3253_v42  ;;  %v3130_v56 = vpack.c.bf16 %v2125_v55, %v2124_v24 }
 0xfaa   : > { %2950 = vmatmul.mubr.msk.f32.vlgmr.msra.gmra.mrb[22].mxu0 %vm356_vm2, %v2652_v53  ;;  %vm2528_vm2 = vcmask 0  }
 0xfab   : > { %3125 = vmatpush3.bf16.msra.mxu0 %v3124_v47  ;;  %2968 = vmatprep.mubr.msk.f32.mxu0 %vm3254_vm5, %v3253_v42  ;;  %v2454_v47 = vld [vmem:[%s3850_s4 + $0x180] sm:$0xff] }
 0xfac   : > { %3126 = vmatprep.subr.bf16.mxu0 %v3252_v41  ;;  %v3190_v49 = vpack.c.bf16 %v2454_v47, %v2453_v45 }
 0xfaf   : > { %3128 = vmatpush3.bf16.msra.mxu0 %v3127_v54 }
 0xfb0   : > { %3129 = vmatprep.subr.bf16.mxu0 %v3252_v41 }
 0xfb3   : > { %3131 = vmatpush3.bf16.msra.mxu0 %v3130_v56 }
 0xfb4   : > { %3132 = vmatprep.subr.bf16.mxu0 %v3252_v41 }
 0xfb7   : > { %3134 = vmatpush3.bf16.msra.mxu0 %v3133_v60 }
 0xfb8   : > { %2990 = vmatprep.subr.mxu0 %v3253_v42 }
0x107d   : > { %v2105_v61 = vpop.f32.mrb[22].mxu0 }
0x107e   : > { %v2110_v62 = vadd.f32 %v2105_v61, %v3610_v51  ;;  %v2111_v63 = vadd.f32 %v2105_v61, %v3613_v52  ;;  %v2951_v0 = vpop.f32.mrb[23].mxu0  ;;  %v2274_v51 = vld [vmem:[%s251_s7] sm:$0x1]  ;;  %v3148_v52 = vpack.c.bf16 %v2354_v2, %v2353_v20  ;;  %v2457_v2 = vld [vmem:[%s3850_s4 + $0x198] sm:$0x1] }
0x1080   : > { %2969 = vmatmul.mubr.msk.f32.vlgmr.msra.gmra.mrb[24].mxu0 %vm548_vm4, %v2111_v63  ;;  %2988 = vmatmul.mubr.msk.f32.vlgmr.msra.gmra.mrb[14].mxu1 %vm548_vm4, %v2110_v62  ;;  %v2369_v62 = vld [vmem:[%s3850_s4 + $0x110] sm:$0x1] }
0x1081   : > { %2991 = vmatpush3.msra.mxu0 %v2275_v1  ;;  %2992 = vmatprep.mubr.msk.f32.mxu0 %vm3254_vm5, %v3253_v42 }
0x1082   : > { %3147 = vmatprep.subr.bf16.mxu0 %v3252_v41  ;;  %3062 = vmatprep.mubr.msk.f32.mxu1 %vm3254_vm5, %v3253_v42 }
0x1083   : > { %3173 = vmatpush3.bf16.msra.mxu1 %v3172_v25 }
0x1084   : > { %2993 = vmatmul.mubr.msk.f32.vlgmr.msra.gmra.mrb[26].mxu0 %vm856_vm0, %v2274_v51  ;;  %3174 = vmatprep.subr.bf16.mxu1 %v3252_v41 }
0x1085   : > { %3149 = vmatpush3.bf16.msra.mxu0 %v3148_v52  ;;  %3027 = vmatprep.mubr.msk.f32.mxu0 %vm3254_vm5, %v3253_v42  ;;  %v2360_v42 = vld [vmem:[%s3850_s4 + $0xc8] sm:$0xff] }
0x1086   : > { %3150 = vmatprep.subr.bf16.mxu0 %v3252_v41  ;;  %v3157_v10 = vpack.c.bf16 %v2360_v42, %v2359_v9 }
0x1087   : > { %3176 = vmatpush3.bf16.msra.mxu1 %v3175_v32 }
0x1088   : > { %3177 = vmatprep.subr.bf16.mxu1 %v3252_v41 }
0x1089   : > { %3152 = vmatpush3.bf16.msra.mxu0 %v3151_v5 }
0x108a   : > { %3153 = vmatprep.subr.bf16.mxu0 %v3252_v41 }
0x108b   : > { %3179 = vmatpush3.bf16.msra.mxu1 %v3178_v34 }
0x108c   : > { %3180 = vmatprep.subr.bf16.mxu1 %v3252_v41 }
0x108d   : > { %3155 = vmatpush3.bf16.msra.mxu0 %v3154_v8 }
0x108e   : > { %3156 = vmatprep.subr.bf16.mxu0 %v3252_v41 }
0x108f   : > { %3182 = vmatpush3.bf16.msra.mxu1 %v3181_v37 }
0x1090   : > { %3183 = vmatprep.subr.bf16.mxu1 %v3252_v41 }
0x1091   : > { %3158 = vmatpush3.bf16.msra.mxu0 %v3157_v10 }
0x1092   : > { %3159 = vmatprep.subr.bf16.mxu0 %v3252_v41 }
0x1093   : > { %3185 = vmatpush3.bf16.msra.mxu1 %v3184_v40 }
0x1094   : > { %3186 = vmatprep.subr.bf16.mxu1 %v3252_v41 }
0x1095   : > { %3161 = vmatpush3.bf16.msra.mxu0 %v3160_v27 }
0x1096   : > { %3162 = vmatprep.subr.bf16.mxu0 %v3252_v41 }
0x1097   : > { %3188 = vmatpush3.bf16.msra.mxu1 %v3187_v46 }
0x1098   : > { %3189 = vmatprep.subr.bf16.mxu1 %v3252_v41 }
0x1099   : > { %3164 = vmatpush3.bf16.msra.mxu0 %v3163_v15 }
0x109a   : > { %3165 = vmatprep.subr.bf16.mxu0 %v3252_v41 }
0x109b   : > { %3191 = vmatpush3.bf16.msra.mxu1 %v3190_v49 }
0x109c   : > { %3192 = vmatprep.subr.bf16.mxu1 %v3252_v41 }
0x109d   : > { %3167 = vmatpush3.bf16.msra.mxu0 %v3166_v18 }
0x109e   : > { %3168 = vmatprep.subr.bf16.mxu0 %v3252_v41  ;;  %v2455_v41 = vld [vmem:[%s3850_s4 + $0x188] sm:$0xff] }
0x109f   : > { %v3193_v61 = vpack.c.bf16 %v2456_v23, %v2455_v41 }
0x10a1   : > { %3170 = vmatpush3.bf16.msra.mxu0 %v3169_v26  ;;  %3194 = vmatpush3.bf16.msra.mxu1 %v3193_v61 }
0x1153   : > { %v2197_v50 = vpop.f32.mrb[24].mxu0  ;;  %v2270_v53 = vpop.f32.mrb[14].mxu1 }
0x1154   : > { %v2271_v54 = vadd.f32 %v2270_v53, %v2197_v50  ;;  %v2970_v24 = vpop.f32.mrb[25].mxu0  ;;  %v2989_v55 = vpop.f32.mrb[15].mxu1 }
0x1157   : > { %v2345_v56 = vpop.f32.mrb[26].mxu0 }
0x1158   : > { %v2349_v58 = vadd.f32 %v2345_v56, %v2271_v54  ;;  %v2994_v59 = vpop.f32.mrb[27].mxu0 }
0x115a   : > { %v2351_v60 = vadd.f32 %v2350_v57, %v2349_v58 }
0x115c   : > { %v2352_v22 = vmax.f32 %v2351_v60, 0.0 }
0x115e   : > { %3028 = vmatmul.mubr.f32.vlgmr.msra.gmra.mrb[28].mxu0 %v2352_v22 }
0x1231   : > { %v2436_v63 = vpop.f32.mrb[28].mxu0 }
0x1232   : > { %v2437_v0 = vadd.f32 %v2436_v63, %v2369_v62  ;;  %v3029_v1 = vpop.f32.mrb[29].mxu0 }
0x1234   : > { %v2440_v20 = vmax.f32 %v2437_v0, 0.0 }
0x1236   : > { %3063 = vmatmul.mubr.f32.vlgmr.msra.gmra.mrb[16].mxu1 %v2440_v20 }
0x1309   : > { %v2524_v51 = vpop.f32.mrb[16].mxu1 }
0x130a   : > { %v2525_v52 = vadd.f32 %v2524_v51, %v2457_v2  ;;  %v3064_v3 = vpop.f32.mrb[17].mxu1 }
0x130c   : > { %2529 = vst.msk [vmem:[%s254_s11] sm:$0x1] %vm2528_vm2, %v2525_v52 }
0x130d PF: > { %s15_s18 = sadd.s32 1, %s3250_s18  }
0x130e   : > { %p12_p4 = scmp.ge.s32.totalorder %s15_s18, 4  }
0x1310   :  { %14 = sbr.rel (!%p12_p4) target bundleno = 1 (0x1), region = 76 }

</bundles_post_ra>
